<compile_context>
chip_gen: v7x
topology: tpu7x:2x2x1
jax: 0.10.0
libtpu: 0.0.40
codegen_flags: <defaults>
</compile_context>

<pallas_src>
import functools

import jax
import jax.numpy as jnp
from jax.experimental import pallas as pl
from jax.experimental.pallas import tpu as pltpu

INPUT_SIZE = 2500
HIDDEN_SIZE = 500
NUM_CLASSES = 2

# Hardware-friendly padded dims (multiples of the (8, 128) vreg tile).
PAD_IN = 2560   # K padded *inside the kernel* to 20 * 128 lanes
PAD_HID = 512   # hidden padded to 4 * 128
PAD_OUT = 128   # output lanes padded for lane-dense stores


def _cdiv(a, b):
    return -(-a // b)


def _round_up(x, m):
    return (x + m - 1) // m * m


def _detect_v7x():
    try:
        kind = jax.devices()[0].device_kind.lower()
    except Exception:
        return False
    return ("v7" in kind) or ("7x" in kind)


_IS_V7X = _detect_v7x()


def _mlp_kernel(x_ref, w1q_ref, s1_ref, b1_ref, w2_ref, o_ref, xs_ref):
    # Stage the f32 x tile into an MXU-aligned bf16 scratch (K: 2500 -> 2560).
    # The cast + masked store run on the VPU and hide under the weight DMA;
    # this removes the host-side pad/cast HBM round trip entirely.
    xs_ref[...] = jnp.zeros_like(xs_ref)
    xs_ref[:, :INPUT_SIZE] = x_ref[...].astype(jnp.bfloat16)

    # Layer 1: int8 weights widened to bf16 (integer values are exact in
    # bf16), bf16 MXU matmul with f32 accumulation, per-output-channel scale
    # applied after the dot, then bias + ReLU in f32.
    w1f = w1q_ref[...].astype(jnp.float32).astype(jnp.bfloat16)
    h = jnp.dot(xs_ref[...], w1f, preferred_element_type=jnp.float32)
    h = jnp.maximum(h * s1_ref[...] + b1_ref[...], 0.0)

    # Layer 2 (lane-dense 128-wide output block).  b2 is added in the wrapper
    # so the hidden-split partials can simply be summed.
    out = jnp.dot(h.astype(jnp.bfloat16), w2_ref[...],
                  preferred_element_type=jnp.float32)
    o_ref[...] = out[None, :, :]


@functools.partial(jax.jit, static_argnames=("block_b",))
def neural_net_forward(x, w1q, s1, b1p, w2p, b2, block_b=512):
    """x: (B, INPUT_SIZE) f32.  (w1q, s1, b1p, w2p, b2) from prepare_params().
    Returns (B, NUM_CLASSES) f32 logits."""
    B = x.shape[0]

    # Batch tile: enough tiles that each is <= block_b, rounded to a multiple
    # of 8, which bounds batch padding to <8 rows per call.
    n_bt = max(1, _cdiv(B, block_b))
    tb = _round_up(_cdiv(B, n_bt), 8)
    Bp = _round_up(B, tb)
    n_bt = Bp // tb

    # x stays f32 / un-padded in K; only the (tiny) batch pad is materialized.
    xp = x if Bp == B else jnp.pad(x, ((0, Bp - B), (0, 0)))

    # v7x has 2 TensorCores: if the batch axis is a single grid step, split
    # the hidden dim across a second parallel grid axis so each core streams
    # only half of w1.  On 1-TC chips keep one hidden tile (weights stay
    # resident with a constant index_map).
    n_hid = 2 if (_IS_V7X and n_bt == 1) else 1
    hid_blk = PAD_HID // n_hid

    grid = (n_bt, n_hid)
    flops = 2 * Bp * (PAD_IN * PAD_HID + PAD_HID * PAD_OUT)
    bytes_accessed = (xp.size * 4 + w1q.size + s1.size * 4 + b1p.size * 4
                      + w2p.size * 2 + n_hid * Bp * PAD_OUT * 4)

    partials = pl.pallas_call(
        _mlp_kernel,
        out_shape=jax.ShapeDtypeStruct((n_hid, Bp, PAD_OUT), jnp.float32),
        grid_spec=pltpu.PrefetchScalarGridSpec(
            num_scalar_prefetch=0,
            grid=grid,
            in_specs=[
                # x tiles stream per batch step (f32, cast in-kernel).
                pl.BlockSpec((tb, INPUT_SIZE), lambda i, j: (i, 0)),
                # Weights / scales / bias: constant over the batch axis, so
                # they are fetched once and stay VMEM-resident.
                pl.BlockSpec((PAD_IN, hid_blk), lambda i, j: (0, j)),
                pl.BlockSpec((1, hid_blk), lambda i, j: (0, j)),
                pl.BlockSpec((1, hid_blk), lambda i, j: (0, j)),
                pl.BlockSpec((hid_blk, PAD_OUT), lambda i, j: (j, 0)),
            ],
            out_specs=pl.BlockSpec((1, tb, PAD_OUT), lambda i, j: (j, i, 0)),
            scratch_shapes=[pltpu.VMEM((tb, PAD_IN), jnp.bfloat16)],
        ),
        compiler_params=pltpu.CompilerParams(
            dimension_semantics=("parallel", "parallel"),
            vmem_limit_bytes=48 * 1024 * 1024),
        cost_estimate=pl.CostEstimate(
            flops=flops, transcendentals=0, bytes_accessed=bytes_accessed),
    )(xp, w1q, s1, b1p, w2p)

    # Sum hidden-split partials (no-op when n_hid == 1), slice the true
    # logits, and add the final bias.
    return partials.sum(axis=0)[:B, :NUM_CLASSES] + b2


def prepare_params(w1, b1, w2, b2):
    """Pad / quantize the logical f32 Linear params once, offline.
    w1: (IN, HID), b1: (HID,), w2: (HID, OUT), b2: (OUT,)."""
    w1_pad = (jnp.zeros((PAD_IN, PAD_HID), jnp.float32)
              .at[:INPUT_SIZE, :HIDDEN_SIZE].set(w1))
    # Symmetric per-output-channel int8 quantization of w1.
    amax = jnp.max(jnp.abs(w1_pad), axis=0, keepdims=True)        # (1, PAD_HID)
    s1 = jnp.where(amax > 0.0, amax / 127.0, 1.0).astype(jnp.float32)
    w1q = jnp.clip(jnp.round(w1_pad / s1), -127.0, 127.0).astype(jnp.int8)
    b1p = jnp.zeros((1, PAD_HID), jnp.float32).at[0, :HIDDEN_SIZE].set(b1)
    w2p = (jnp.zeros((PAD_HID, PAD_OUT), jnp.float32)
           .at[:HIDDEN_SIZE, :NUM_CLASSES].set(w2).astype(jnp.bfloat16))
    return w1q, s1, b1p, w2p, b2


def init_params(key):
    """Deterministic init matching nn.Linear defaults
    (U[-1/sqrt(fan_in), +1/sqrt(fan_in)]); weights stored as (in, out)."""
    k1, k2, k3, k4 = jax.random.split(key, 4)
    bound1 = 1.0 / (INPUT_SIZE ** 0.5)
    w1 = jax.random.uniform(k1, (INPUT_SIZE, HIDDEN_SIZE), jnp.float32,
                            minval=-bound1, maxval=bound1)
    b1 = jax.random.uniform(k2, (HIDDEN_SIZE,), jnp.float32,
                            minval=-bound1, maxval=bound1)
    bound2 = 1.0 / (HIDDEN_SIZE ** 0.5)
    w2 = jax.random.uniform(k3, (HIDDEN_SIZE, NUM_CLASSES), jnp.float32,
                            minval=-bound2, maxval=bound2)
    b2 = jax.random.uniform(k4, (NUM_CLASSES,), jnp.float32,
                            minval=-bound2, maxval=bound2)
    return w1, b1, w2, b2


if __name__ == "__main__":
    key = jax.random.PRNGKey(0)
    kx, kp = jax.random.split(key)

    B = 4  # small batch; exercises the (<8-row) batch-padding path
    x = jax.random.normal(kx, (B, INPUT_SIZE), jnp.float32)
    w1, b1, w2, b2 = init_params(kp)
    params = prepare_params(w1, b1, w2, b2)

    out = neural_net_forward(x, *params)
    out = jax.block_until_ready(out)
    assert out.shape == (B, NUM_CLASSES)

    # Reference: exact f32 module math.  bf16 activations + per-channel int8
    # w1 give ~1e-3 absolute error on O(0.3) logits, well inside tolerance.
    ref = jnp.maximum(x @ w1 + b1, 0.0) @ w2 + b2
    assert jnp.allclose(out, ref, atol=2e-2, rtol=2e-2), (
        "kernel output drifted from the f32 reference")

    print("KERNEL_OK")
</pallas_src>

<mosaic_0001>
module attributes {stable_mosaic.version = 11 : i64} {
  func.func @_mlp_kernel(%arg0: i32, %arg1: i32, %arg2: memref<8x2500xf32, #tpu.memory_space<vmem>>, %arg3: memref<2560x512xi8, #tpu.memory_space<vmem>>, %arg4: memref<1x512xf32, #tpu.memory_space<vmem>>, %arg5: memref<1x512xf32, #tpu.memory_space<vmem>>, %arg6: memref<512x128xbf16, #tpu.memory_space<vmem>>, %arg7: memref<1x8x128xf32, #tpu.memory_space<vmem>>, %arg8: memref<8x2560xbf16, #tpu.memory_space<vmem>>) attributes {dimension_semantics = [#tpu.dimension_semantics<parallel>, #tpu.dimension_semantics<parallel>], iteration_bounds = array<i64: 1, 1>, scalar_prefetch = 0 : i64, scratch_operands = 1 : i64, tpu.core_type = #tpu.core_type<tc>, window_params = [{transform_indices = @transform_0, window_bounds = array<i64: 8, 2500>}, {transform_indices = @transform_1, window_bounds = array<i64: 2560, 512>}, {transform_indices = @transform_2, window_bounds = array<i64: 1, 512>}, {transform_indices = @transform_3, window_bounds = array<i64: 1, 512>}, {transform_indices = @transform_4, window_bounds = array<i64: 512, 128>}, {transform_indices = @transform_5, window_bounds = array<i64: 1, 8, 128>}]} {
    %cst = arith.constant 0.000000e+00 : bf16
    %0 = vector.broadcast %cst : bf16 to vector<8x2560xbf16>
    %c0 = arith.constant 0 : index
    %c0_0 = arith.constant 0 : index
    %1 = vector.load %arg8[%c0, %c0_0] : memref<8x2560xbf16, #tpu.memory_space<vmem>>, vector<8x2560xbf16>
    tpu.vector_store %arg8[%c0, %c0_0], %0 {strides = array<i32>} : memref<8x2560xbf16, #tpu.memory_space<vmem>>, vector<8x2560xbf16>,
    %c0_1 = arith.constant 0 : index
    %c0_2 = arith.constant 0 : index
    %2 = vector.load %arg2[%c0_1, %c0_2] : memref<8x2500xf32, #tpu.memory_space<vmem>>, vector<8x2500xf32>
    %3 = arith.truncf %2 : vector<8x2500xf32> to vector<8x2500xbf16>
    %c0_3 = arith.constant 0 : index
    %c0_4 = arith.constant 0 : index
    %4 = vector.load %arg8[%c0_3, %c0_4] : memref<8x2560xbf16, #tpu.memory_space<vmem>>, vector<8x2500xbf16>
    tpu.vector_store %arg8[%c0_3, %c0_4], %3 {strides = array<i32>} : memref<8x2560xbf16, #tpu.memory_space<vmem>>, vector<8x2500xbf16>,
    %c0_5 = arith.constant 0 : index
    %c0_6 = arith.constant 0 : index
    %5 = vector.load %arg3[%c0_5, %c0_6] : memref<2560x512xi8, #tpu.memory_space<vmem>>, vector<2560x512xi8>
    %6 = arith.sitofp %5 : vector<2560x512xi8> to vector<2560x512xf32>
    %7 = arith.truncf %6 : vector<2560x512xf32> to vector<2560x512xbf16>
    %c0_7 = arith.constant 0 : index
    %c0_8 = arith.constant 0 : index
    %8 = vector.load %arg8[%c0_7, %c0_8] : memref<8x2560xbf16, #tpu.memory_space<vmem>>, vector<8x2560xbf16>
    %cst_9 = arith.constant dense<0.000000e+00> : vector<8x512xf32>
    %9 = tpu.matmul %8, %7, %cst_9 {dimension_numbers = #tpu.dot_dimension_numbers<[1], [0], [0], [1], [0, 0, 1, 1], [], []>} : vector<8x2560xbf16>, vector<2560x512xbf16>, vector<8x512xf32> -> vector<8x512xf32>
    %c0_10 = arith.constant 0 : index
    %c0_11 = arith.constant 0 : index
    %10 = vector.load %arg4[%c0_10, %c0_11] : memref<1x512xf32, #tpu.memory_space<vmem>>, vector<1x512xf32>
    %11 = vector.broadcast %10 : vector<1x512xf32> to vector<8x512xf32>
    %12 = arith.mulf %9, %11 : vector<8x512xf32>
    %c0_12 = arith.constant 0 : index
    %c0_13 = arith.constant 0 : index
    %13 = vector.load %arg5[%c0_12, %c0_13] : memref<1x512xf32, #tpu.memory_space<vmem>>, vector<1x512xf32>
    %14 = vector.broadcast %13 : vector<1x512xf32> to vector<8x512xf32>
    %15 = arith.addf %12, %14 : vector<8x512xf32>
    %cst_14 = arith.constant 0.000000e+00 : f32
    %16 = vector.broadcast %cst_14 : f32 to vector<8x512xf32>
    %17 = arith.maximumf %15, %16 : vector<8x512xf32>
    %18 = arith.truncf %17 : vector<8x512xf32> to vector<8x512xbf16>
    %c0_15 = arith.constant 0 : index
    %c0_16 = arith.constant 0 : index
    %19 = vector.load %arg6[%c0_15, %c0_16] : memref<512x128xbf16, #tpu.memory_space<vmem>>, vector<512x128xbf16>
    %cst_17 = arith.constant dense<0.000000e+00> : vector<8x128xf32>
    %20 = tpu.matmul %18, %19, %cst_17 {dimension_numbers = #tpu.dot_dimension_numbers<[1], [0], [0], [1], [0, 0, 1, 1], [], []>} : vector<8x512xbf16>, vector<512x128xbf16>, vector<8x128xf32> -> vector<8x128xf32>
    %21 = vector.shape_cast %20 : vector<8x128xf32> to vector<1x8x128xf32>
    %c0_18 = arith.constant 0 : index
    %c0_19 = arith.constant 0 : index
    %c0_20 = arith.constant 0 : index
    %22 = vector.load %arg7[%c0_18, %c0_19, %c0_20] : memref<1x8x128xf32, #tpu.memory_space<vmem>>, vector<1x8x128xf32>
    tpu.vector_store %arg7[%c0_18, %c0_19, %c0_20], %21 {strides = array<i32>} : memref<1x8x128xf32, #tpu.memory_space<vmem>>, vector<1x8x128xf32>,
    return
  }
  func.func @transform_0(%arg0: i32, %arg1: i32) -> (i32, i32) {
    %c0_i32 = arith.constant 0 : i32
    %c0_i32_0 = arith.constant 0 : i32
    return %arg0, %c0_i32 : i32, i32
  }
  func.func @transform_1(%arg0: i32, %arg1: i32) -> (i32, i32) {
    %c0_i32 = arith.constant 0 : i32
    %c0_i32_0 = arith.constant 0 : i32
    return %c0_i32, %arg1 : i32, i32
  }
  func.func @transform_2(%arg0: i32, %arg1: i32) -> (i32, i32) {
    %c0_i32 = arith.constant 0 : i32
    %c0_i32_0 = arith.constant 0 : i32
    return %c0_i32, %arg1 : i32, i32
  }
  func.func @transform_3(%arg0: i32, %arg1: i32) -> (i32, i32) {
    %c0_i32 = arith.constant 0 : i32
    %c0_i32_0 = arith.constant 0 : i32
    return %c0_i32, %arg1 : i32, i32
  }
  func.func @transform_4(%arg0: i32, %arg1: i32) -> (i32, i32) {
    %c0_i32 = arith.constant 0 : i32
    %c0_i32_0 = arith.constant 0 : i32
    return %arg1, %c0_i32 : i32, i32
  }
  func.func @transform_5(%arg0: i32, %arg1: i32) -> (i32, i32, i32) {
    %c0_i32 = arith.constant 0 : i32
    %c0_i32_0 = arith.constant 0 : i32
    return %arg1, %arg0, %c0_i32 : i32, i32, i32
  }
}

</mosaic_0001>

<bundles_post_ra>
// kernel: neural_net_forward.1
= control target key start
LH: loop header
LB: loop body
LE: loop exit
PB: predicated region body
PF: predicated region fallthrough
CT: control target
= control target key end

     0   :  { %10 = vsyncpa [#allocation4], 0  ;;  %s3040_s0 = inlined_call_operand.vmem [shape: f32[8,2500], index: 0, kind: input, shape index: {}]   ;;  %s3041_s1 = inlined_call_operand.hbm [shape: s8[2560,512], index: 1, kind: input, shape index: {}]   ;;  %s3042_s2 = inlined_call_operand.hbm [shape: f32[1,512], index: 2, kind: input, shape index: {}]   ;;  %s3043_s3 = inlined_call_operand.hbm [shape: f32[1,512], index: 3, kind: input, shape index: {}]   ;;  %s3044_s4 = inlined_call_operand.hbm [shape: bf16[512,128], index: 4, kind: input, shape index: {}]   ;;  %s3045_s5 = inlined_call_operand.vmem [shape: f32[1,8,128], index: 5, kind: output, shape index: {}]  }
   0x1   :  { %11 = vsyncpa [#allocation6], 0 }
   0x2   :  { %12 = vsyncpa [#allocation9], 0  ;;  %s2802_s18 = smov [#allocation5]   ;;  %s2803_s20 = smov [#allocation3]  }
   0x3   :  { %s33_s19 = sshll.u32 %s2802_s18, 4  ;;  %s20_s21 = sshll.u32 %s2803_s20, 4  ;;  %s34_s19 = int_to_ptr.vmem [resolvable:$true] %s33_s19  ;;  %s2841_s21 = int_to_ptr.vmem [resolvable:$true] %s20_s21 }
   0x4   :  { %s2708_s24 = scalar_lea.hbm %s3042_s2, 64 }
   0x5   :  { %p2709_p0 = scmp.ne.s32.totalorder %s3042_s2, %s2708_s24  ;;  %p2712_p1 = scmp.lt.u32.totalorder %s2708_s24, %s3042_s2 }
   0x7   :  { %p2714_p2 = pnand %p2712_p1, %p2709_p0 }
   0x9   :  { %2717 = shalt.err (!%p2714_p2)
}
   0xa   :  { %s2718_s29 = scalar_lea.vmem %s34_s19, 64  ;;  %p2723_p4 = scmp.lt.s32.totalorder %s34_s19, %s34_s19 }
   0xb   :  { %p2719_p3 = scmp.ne.s32.totalorder %s34_s19, %s2718_s29  ;;  %p2724_p5 = scmp.lt.s32.totalorder %s2718_s29, %s2718_s29 }
   0xd   :  { %p2725_p6 = por %p2724_p5, %p2723_p4 }
   0xf   :  { %p2726_p7 = pnand %p2725_p6, %p2719_p3 }
  0x11   :  { %2729 = shalt.err (!%p2726_p7)
}
  0x12   :  { %36 = dma.hbm_to_vmem [thread:$0]  %s3042_s2, 64, %s34_s19, [#allocation6]  }
  0x13   :  { %s2730_s9 = scalar_lea.hbm %s3041_s1, 40960 }
  0x14   :  { %p2731_p8 = scmp.ne.s32.totalorder %s3041_s1, %s2730_s9  ;;  %p2734_p9 = scmp.lt.u32.totalorder %s2730_s9, %s3041_s1 }
  0x16   :  { %p2736_p10 = pnand %p2734_p9, %p2731_p8 }
  0x18   :  { %2739 = shalt.err (!%p2736_p10)
}
  0x19   :  { %s2740_s14 = scalar_lea.vmem %s2841_s21, 40960  ;;  %p2745_p12 = scmp.lt.s32.totalorder %s2841_s21, %s2841_s21 }
  0x1a   :  { %p2741_p11 = scmp.ne.s32.totalorder %s2841_s21, %s2740_s14  ;;  %p2746_p13 = scmp.lt.s32.totalorder %s2740_s14, %s2740_s14 }
  0x1c   :  { %p2747_p0 = por %p2746_p13, %p2745_p12 }
  0x1e   :  { %p2748_p1 = pnand %p2747_p0, %p2741_p11 }
  0x20   :  { %2751 = shalt.err (!%p2748_p1)
}
  0x21   :  { %s2804_s2 = smov 512   ;;  %s2805_s15 = smov 32  }
  0x22   :  { %26 = dma.hbm_to_vmem [thread:$0]  %s3041_s1, 40960, %s2841_s21, [#allocation4], %s2804_s2, %s2804_s2, %s2805_s15  }
  0x23   :  { %s2806_s18 = smov [#allocation7]   ;;  %s2807_s20 = smov [#allocation8]  }
  0x24   :  { %s43_s19 = sshll.u32 %s2806_s18, 4  ;;  %s52_s22 = sshll.u32 %s2807_s20, 4  ;;  %s44_s19 = int_to_ptr.vmem [resolvable:$true] %s43_s19  ;;  %s2872_s22 = int_to_ptr.vmem [resolvable:$true] %s52_s22 }
  0x25   :  { %s2752_s25 = scalar_lea.hbm %s3043_s3, 64 }
  0x26   :  { %p2753_p2 = scmp.ne.s32.totalorder %s3043_s3, %s2752_s25  ;;  %p2756_p3 = scmp.lt.u32.totalorder %s2752_s25, %s3043_s3 }
  0x28   :  { %p2758_p4 = pnand %p2756_p3, %p2753_p2 }
  0x2a   :  { %2761 = shalt.err (!%p2758_p4)
}
  0x2b   :  { %s2762_s1 = scalar_lea.vmem %s44_s19, 64  ;;  %p2767_p6 = scmp.lt.s32.totalorder %s44_s19, %s44_s19 }
  0x2c   :  { %p2763_p5 = scmp.ne.s32.totalorder %s44_s19, %s2762_s1  ;;  %p2768_p7 = scmp.lt.s32.totalorder %s2762_s1, %s2762_s1 }
  0x2e   :  { %p2769_p8 = por %p2768_p7, %p2767_p6 }
  0x30   :  { %p2770_p9 = pnand %p2769_p8, %p2763_p5 }
  0x32   :  { %2773 = shalt.err (!%p2770_p9)
}
  0x33   :  { %46 = dma.hbm_to_vmem [thread:$0]  %s3043_s3, 64, %s44_s19, [#allocation6]  }
  0x34   :  { %s2774_s8 = scalar_lea.hbm %s3044_s4, 4096 }
  0x35   :  { %p2775_p10 = scmp.ne.s32.totalorder %s3044_s4, %s2774_s8  ;;  %p2778_p11 = scmp.lt.u32.totalorder %s2774_s8, %s3044_s4 }
  0x37   :  { %p2780_p12 = pnand %p2778_p11, %p2775_p10 }
  0x39   :  { %2783 = shalt.err (!%p2780_p12)
}
  0x3a   :  { %s2784_s13 = scalar_lea.vmem %s2872_s22, 4096  ;;  %p2789_p0 = scmp.lt.s32.totalorder %s2872_s22, %s2872_s22 }
  0x3b   :  { %p2785_p13 = scmp.ne.s32.totalorder %s2872_s22, %s2784_s13  ;;  %p2790_p1 = scmp.lt.s32.totalorder %s2784_s13, %s2784_s13 }
  0x3d   :  { %p2791_p2 = por %p2790_p1, %p2789_p0 }
  0x3f   :  { %p2792_p3 = pnand %p2791_p2, %p2785_p13 }
  0x41   :  { %2795 = shalt.err (!%p2792_p3)
}
  0x42   :  { %s2808_s3 = smov 64   ;;  %s2809_s14 = smov 4  }
  0x43   :  { %58 = dma.hbm_to_vmem [thread:$0]  %s3044_s4, 4096, %s2872_s22, [#allocation9], %s2808_s3, %s2808_s3, %s2809_s14  }
  0x44   :  { %2796 = dma.done.wait [#allocation4], 40960  }
  0x45   :  { %2797 = vsyncadd [#allocation4], 4294926336 }
  0x46   :  { %2798 = dma.done.wait [#allocation6], 128  }
  0x47   :  { %2799 = vsyncadd [#allocation6], 4294967168 }
  0x48   :  { %2800 = dma.done.wait [#allocation9], 4096  }
  0x49   :  { %2801 = vsyncadd [#allocation9], 4294963200  ;;  %v2810_v0 = vmov 0   ;;  %v196_v1 = vld [vmem:[#allocation3 + $0x8] sm:$0xff]  ;;  %v198_v2 = vld [vmem:[#allocation3 + $0x18] sm:$0xff]  ;;  %vm191_vm0 = vcmask 1043456  }
  0x4a   :  { %81 = vst [vmem:[#allocation2 + $0x48] sm:$0xff] %v2810_v0  ;;  %v195_v3 = vld [vmem:[#allocation3] sm:$0xff]  ;;  %v516_v4 = vunpack.c.l.s8.bf16 %v196_v1  ;;  %v520_v5 = vunpack.c.h.s8.bf16 %v196_v1  ;;  %v518_v6 = vunpack.c.l.s8.bf16 %v198_v2  ;;  %v522_v7 = vunpack.c.h.s8.bf16 %v198_v2  ;;  %v197_v8 = vld [vmem:[#allocation3 + $0x10] sm:$0xff]  ;;  %v200_v11 = vld [vmem:[#allocation3 + $0x28] sm:$0xff] }
  0x4b   :  { %v515_v9 = vunpack.c.l.s8.bf16 %v195_v3  ;;  %v517_v10 = vunpack.c.l.s8.bf16 %v197_v8  ;;  %v202_v12 = vld [vmem:[#allocation3 + $0x38] sm:$0xff]  ;;  %v519_v13 = vunpack.c.h.s8.bf16 %v195_v3  ;;  %v521_v14 = vunpack.c.h.s8.bf16 %v197_v8  ;;  %v199_v17 = vld [vmem:[#allocation3 + $0x20] sm:$0xff]  ;;  %v201_v18 = vld [vmem:[#allocation3 + $0x30] sm:$0xff] }
  0x4c   :  { %1235 = vmatprep.subr.bf16.mxu0 %v516_v4  ;;  %1645 = vmatprep.subr.bf16.mxu1 %v518_v6  ;;  %v524_v15 = vunpack.c.l.s8.bf16 %v200_v11  ;;  %v526_v16 = vunpack.c.l.s8.bf16 %v202_v12  ;;  %v523_v19 = vunpack.c.l.s8.bf16 %v199_v17  ;;  %v525_v20 = vunpack.c.l.s8.bf16 %v201_v18  ;;  %v204_v23 = vld [vmem:[#allocation3 + $0x48] sm:$0xff]  ;;  %v206_v24 = vld [vmem:[#allocation3 + $0x58] sm:$0xff]  ;;  %v203_v29 = vld [vmem:[#allocation3 + $0x40] sm:$0xff] }
  0x4d   :  { %1236 = vmatpush1.bf16.msra.mxu0 %v515_v9  ;;  %1646 = vmatpush1.bf16.msra.mxu1 %v517_v10  ;;  %v528_v21 = vunpack.c.h.s8.bf16 %v200_v11  ;;  %v530_v22 = vunpack.c.h.s8.bf16 %v202_v12  ;;  %v527_v25 = vunpack.c.h.s8.bf16 %v199_v17  ;;  %v529_v26 = vunpack.c.h.s8.bf16 %v201_v18  ;;  %v205_v30 = vld [vmem:[#allocation3 + $0x50] sm:$0xff]  ;;  %v83_v32 = vld [vmem:[%s3040_s0 + $0x8] sm:$0xff]  ;;  %v208_v37 = vld [vmem:[#allocation3 + $0x68] sm:$0xff] }
  0x4e   :  { %1237 = vmatprep.subr.bf16.mxu0 %v520_v5  ;;  %1647 = vmatprep.subr.bf16.mxu1 %v522_v7  ;;  %v532_v27 = vunpack.c.l.s8.bf16 %v204_v23  ;;  %v534_v28 = vunpack.c.l.s8.bf16 %v206_v24  ;;  %v2906_v31 = vld [vmem:[%s3040_s0] sm:$0xff]  ;;  %v531_v33 = vunpack.c.l.s8.bf16 %v203_v29  ;;  %v533_v34 = vunpack.c.l.s8.bf16 %v205_v30  ;;  %v210_v38 = vld [vmem:[#allocation3 + $0x78] sm:$0xff]  ;;  %v207_v44 = vld [vmem:[#allocation3 + $0x60] sm:$0xff] }
  0x4f   :  { %v536_v35 = vunpack.c.h.s8.bf16 %v204_v23  ;;  %v538_v36 = vunpack.c.h.s8.bf16 %v206_v24  ;;  %v2690_v39 = vpack.c.bf16 %v83_v32, %v83_v32  ;;  %v535_v40 = vunpack.c.h.s8.bf16 %v203_v29  ;;  %v209_v45 = vld [vmem:[#allocation3 + $0x70] sm:$0xff]  ;;  %v212_v50 = vld [vmem:[#allocation3 + $0x88] sm:$0xff]  ;;  %v214_v51 = vld [vmem:[#allocation3 + $0x98] sm:$0xff] }
  0x50   :  { %v537_v41 = vunpack.c.h.s8.bf16 %v205_v30  ;;  %v540_v42 = vunpack.c.l.s8.bf16 %v208_v37  ;;  %v542_v43 = vunpack.c.l.s8.bf16 %v210_v38  ;;  %v539_v46 = vunpack.c.l.s8.bf16 %v207_v44  ;;  %v211_v52 = vld [vmem:[#allocation3 + $0x80] sm:$0xff]  ;;  %v213_v53 = vld [vmem:[#allocation3 + $0x90] sm:$0xff]  ;;  %v2919_v57 = vld [vmem:[%s3040_s0 + $0x18] sm:$0xff] }
  0x51   :  { %1238 = vmatpush1.bf16.msra.mxu0 %v519_v13  ;;  %1648 = vmatpush1.bf16.msra.mxu1 %v521_v14  ;;  %v541_v47 = vunpack.c.l.s8.bf16 %v209_v45  ;;  %v544_v48 = vunpack.c.h.s8.bf16 %v208_v37  ;;  %v546_v49 = vunpack.c.h.s8.bf16 %v210_v38  ;;  %v543_v54 = vunpack.c.h.s8.bf16 %v207_v44  ;;  %v2914_v56 = vld [vmem:[%s3040_s0 + $0x10] sm:$0xff]  ;;  %v216_v0 = vld [vmem:[#allocation3 + $0xa8] sm:$0xff]  ;;  %v218_v1 = vld [vmem:[#allocation3 + $0xb8] sm:$0xff] }
  0x52   :  { %1239 = vmatprep.subr.bf16.mxu0 %v524_v15  ;;  %1649 = vmatprep.subr.bf16.mxu1 %v526_v16  ;;  %v545_v55 = vunpack.c.h.s8.bf16 %v209_v45  ;;  %v548_v58 = vunpack.c.l.s8.bf16 %v212_v50  ;;  %v550_v59 = vunpack.c.l.s8.bf16 %v214_v51  ;;  %v547_v60 = vunpack.c.l.s8.bf16 %v211_v52  ;;  %v215_v2 = vld [vmem:[#allocation3 + $0xa0] sm:$0xff]  ;;  %v217_v3 = vld [vmem:[#allocation3 + $0xb0] sm:$0xff]  ;;  %v220_v12 = vld [vmem:[#allocation3 + $0xc8] sm:$0xff] }
  0x53   :  { %1267 = vmatprep.mubr.bf16.mxu0 %v2690_v39  ;;  %1677 = vmatprep.mubr.bf16.mxu1 %v2690_v39  ;;  %v549_v61 = vunpack.c.l.s8.bf16 %v213_v53  ;;  %v552_v62 = vunpack.c.h.s8.bf16 %v212_v50  ;;  %v554_v63 = vunpack.c.h.s8.bf16 %v214_v51  ;;  %v551_v4 = vunpack.c.h.s8.bf16 %v211_v52  ;;  %v222_v13 = vld [vmem:[#allocation3 + $0xd8] sm:$0xff]  ;;  %v219_v14 = vld [vmem:[#allocation3 + $0xc0] sm:$0xff]  ;;  %v221_v15 = vld [vmem:[#allocation3 + $0xd0] sm:$0xff] }
  0x54   :  { %v553_v5 = vunpack.c.h.s8.bf16 %v213_v53  ;;  %v556_v6 = vunpack.c.l.s8.bf16 %v216_v0  ;;  %v558_v7 = vunpack.c.l.s8.bf16 %v218_v1  ;;  %v555_v8 = vunpack.c.l.s8.bf16 %v215_v2  ;;  %v224_v24 = vld [vmem:[#allocation3 + $0xe8] sm:$0xff]  ;;  %v223_v30 = vld [vmem:[#allocation3 + $0xe0] sm:$0xff]  ;;  %v225_v32 = vld [vmem:[#allocation3 + $0xf0] sm:$0xff] }
  0x55   :  { %1240 = vmatpush1.bf16.msra.mxu0 %v523_v19  ;;  %1650 = vmatpush1.bf16.msra.mxu1 %v525_v20  ;;  %v557_v9 = vunpack.c.l.s8.bf16 %v217_v3  ;;  %v560_v10 = vunpack.c.h.s8.bf16 %v216_v0  ;;  %v562_v11 = vunpack.c.h.s8.bf16 %v218_v1  ;;  %v559_v16 = vunpack.c.h.s8.bf16 %v215_v2  ;;  %v228_v37 = vld [vmem:[#allocation3 + $0x108] sm:$0xff]  ;;  %v230_v38 = vld [vmem:[#allocation3 + $0x118] sm:$0xff]  ;;  %v229_v44 = vld [vmem:[#allocation3 + $0x110] sm:$0xff] }
  0x56   :  { %1241 = vmatprep.subr.bf16.mxu0 %v528_v21  ;;  %1651 = vmatprep.subr.bf16.mxu1 %v530_v22  ;;  %v561_v17 = vunpack.c.h.s8.bf16 %v217_v3  ;;  %v564_v18 = vunpack.c.l.s8.bf16 %v220_v12  ;;  %v566_v19 = vunpack.c.l.s8.bf16 %v222_v13  ;;  %v563_v20 = vunpack.c.l.s8.bf16 %v219_v14  ;;  %v2924_v45 = vld [vmem:[%s3040_s0 + $0x20] sm:$0xff]  ;;  %v232_v52 = vld [vmem:[#allocation3 + $0x128] sm:$0xff]  ;;  %v234_v53 = vld [vmem:[#allocation3 + $0x138] sm:$0xff] }
  0x57   :  { %v565_v21 = vunpack.c.l.s8.bf16 %v221_v15  ;;  %v568_v22 = vunpack.c.h.s8.bf16 %v220_v12  ;;  %v570_v23 = vunpack.c.h.s8.bf16 %v222_v13  ;;  %v575_v39 = vunpack.c.h.s8.bf16 %v223_v30  ;;  %v236_v1 = vld [vmem:[#allocation3 + $0x148] sm:$0xff]  ;;  %v238_v2 = vld [vmem:[#allocation3 + $0x158] sm:$0xff] }
  0x58   :  { %v584_v50 = vunpack.c.h.s8.bf16 %v228_v37  ;;  %v586_v51 = vunpack.c.h.s8.bf16 %v230_v38  ;;  %v594_v0 = vunpack.c.h.s8.bf16 %v234_v53  ;;  %v602_v12 = vunpack.c.h.s8.bf16 %v238_v2  ;;  %v240_v13 = vld [vmem:[#allocation3 + $0x168] sm:$0xff] }
  0x59   :  { %1242 = vmatpush1.bf16.msra.mxu0 %v527_v25  ;;  %1652 = vmatpush1.bf16.msra.mxu1 %v529_v26  ;;  %v226_v25 = vld [vmem:[#allocation3 + $0xf8] sm:$0xff]  ;;  %v567_v26 = vunpack.c.h.s8.bf16 %v219_v14  ;;  %vm192_vm1 = vcmask 556036  }
  0x5a   :  { %1243 = vmatprep.subr.bf16.mxu0 %v532_v27  ;;  %1653 = vmatprep.subr.bf16.mxu1 %v534_v28  ;;  %v569_v27 = vunpack.c.h.s8.bf16 %v221_v15  ;;  %v572_v28 = vunpack.c.l.s8.bf16 %v224_v24  ;;  %v574_v29 = vunpack.c.l.s8.bf16 %v226_v25  ;;  %v242_v14 = vld [vmem:[#allocation3 + $0x178] sm:$0xff]  ;;  %vm193_vm2 = vmor %vm192_vm1, %vm191_vm0 }
  0x5d   :  { %1244 = vmatpush1.bf16.msra.mxu0 %v531_v33  ;;  %1654 = vmatpush1.bf16.msra.mxu1 %v533_v34  ;;  %v571_v33 = vunpack.c.l.s8.bf16 %v223_v30  ;;  %v573_v34 = vunpack.c.l.s8.bf16 %v225_v32 }
  0x5e   :  { %1245 = vmatprep.subr.bf16.mxu0 %v536_v35  ;;  %1655 = vmatprep.subr.bf16.mxu1 %v538_v36  ;;  %v576_v35 = vunpack.c.h.s8.bf16 %v224_v24  ;;  %v578_v36 = vunpack.c.h.s8.bf16 %v226_v25  ;;  %v610_v24 = vunpack.c.h.s8.bf16 %v242_v14  ;;  %v244_v25 = vld [vmem:[#allocation3 + $0x188] sm:$0xff] }
  0x61   :  { %1246 = vmatpush1.bf16.msra.mxu0 %v535_v40  ;;  %1656 = vmatpush1.bf16.msra.mxu1 %v537_v41  ;;  %v577_v40 = vunpack.c.h.s8.bf16 %v225_v32  ;;  %v580_v41 = vunpack.c.l.s8.bf16 %v228_v37  ;;  %v243_v32 = vld [vmem:[#allocation3 + $0x180] sm:$0xff] }
  0x62   :  { %1247 = vmatprep.subr.bf16.mxu0 %v540_v42  ;;  %1657 = vmatprep.subr.bf16.mxu1 %v542_v43  ;;  %v582_v42 = vunpack.c.l.s8.bf16 %v230_v38  ;;  %v227_v43 = vld [vmem:[#allocation3 + $0x100] sm:$0xff]  ;;  %v248_v38 = vld [vmem:[#allocation3 + $0x1a8] sm:$0xff] }
  0x65   :  { %1248 = vmatpush1.bf16.msra.mxu0 %v539_v46  ;;  %1658 = vmatpush1.bf16.msra.mxu1 %v541_v47  ;;  %v2929_v46 = vld [vmem:[%s3040_s0 + $0x28] sm:$0xff]  ;;  %v2691_v47 = vpack.c.bf16 %v2906_v31, %v2906_v31  ;;  %v588_v31 = vunpack.c.l.s8.bf16 %v232_v52 }
  0x66   :  { %1249 = vmatprep.subr.bf16.mxu0 %v544_v48  ;;  %1659 = vmatprep.subr.bf16.mxu1 %v546_v49  ;;  %v579_v48 = vunpack.c.l.s8.bf16 %v227_v43  ;;  %v581_v49 = vunpack.c.l.s8.bf16 %v229_v44 }
  0x69   :  { %1250 = vmatpush1.bf16.msra.mxu0 %v543_v54  ;;  %1660 = vmatpush1.bf16.msra.mxu1 %v545_v55  ;;  %v2692_v54 = vpack.c.bf16 %v2919_v57, %v2919_v57  ;;  %v583_v55 = vunpack.c.h.s8.bf16 %v227_v43  ;;  %v592_v57 = vunpack.c.h.s8.bf16 %v232_v52  ;;  %v252_v52 = vld [vmem:[#allocation3 + $0x1c8] sm:$0xff] }
  0x6a   :  { %1251 = vmatprep.subr.bf16.mxu0 %v548_v58  ;;  %1661 = vmatprep.subr.bf16.mxu1 %v550_v59  ;;  %v585_v58 = vunpack.c.h.s8.bf16 %v229_v44  ;;  %v590_v59 = vunpack.c.l.s8.bf16 %v234_v53  ;;  %v247_v44 = vld [vmem:[#allocation3 + $0x1a0] sm:$0xff]  ;;  %v254_v53 = vld [vmem:[#allocation3 + $0x1d8] sm:$0xff] }
  0x6d   :  { %1252 = vmatpush1.bf16.msra.mxu0 %v547_v60  ;;  %1662 = vmatpush1.bf16.msra.mxu1 %v549_v61  ;;  %v231_v60 = vld [vmem:[#allocation3 + $0x120] sm:$0xff]  ;;  %v233_v61 = vld [vmem:[#allocation3 + $0x130] sm:$0xff] }
  0x6e   :  { %1253 = vmatprep.subr.bf16.mxu0 %v552_v62  ;;  %1663 = vmatprep.subr.bf16.mxu1 %v554_v63  ;;  %v587_v62 = vunpack.c.l.s8.bf16 %v231_v60  ;;  %v589_v63 = vunpack.c.l.s8.bf16 %v233_v61  ;;  %v591_v3 = vunpack.c.h.s8.bf16 %v231_v60  ;;  %v253_v60 = vld [vmem:[#allocation3 + $0x1d0] sm:$0xff] }
  0x71   :  { %1254 = vmatpush1.bf16.msra.mxu0 %v551_v4  ;;  %1664 = vmatpush1.bf16.msra.mxu1 %v553_v5  ;;  %v593_v4 = vunpack.c.h.s8.bf16 %v233_v61  ;;  %v596_v5 = vunpack.c.l.s8.bf16 %v236_v1 }
  0x72   :  { %1255 = vmatprep.subr.bf16.mxu0 %v556_v6  ;;  %1665 = vmatprep.subr.bf16.mxu1 %v558_v7  ;;  %v598_v6 = vunpack.c.l.s8.bf16 %v238_v2  ;;  %v235_v7 = vld [vmem:[#allocation3 + $0x140] sm:$0xff] }
  0x73   :  { %v599_v15 = vunpack.c.h.s8.bf16 %v235_v7 }
  0x75   :  { %1256 = vmatpush1.bf16.msra.mxu0 %v555_v8  ;;  %1666 = vmatpush1.bf16.msra.mxu1 %v557_v9  ;;  %v237_v8 = vld [vmem:[#allocation3 + $0x150] sm:$0xff]  ;;  %v595_v9 = vunpack.c.l.s8.bf16 %v235_v7 }
  0x76   :  { %1257 = vmatprep.subr.bf16.mxu0 %v560_v10  ;;  %1667 = vmatprep.subr.bf16.mxu1 %v562_v11  ;;  %v597_v10 = vunpack.c.l.s8.bf16 %v237_v8  ;;  %v600_v11 = vunpack.c.h.s8.bf16 %v236_v1  ;;  %v258_v1 = vld [vmem:[#allocation3 + $0x1f8] sm:$0xff]  ;;  %v257_v7 = vld [vmem:[#allocation3 + $0x1f0] sm:$0xff] }
  0x79   :  { %1258 = vmatpush1.bf16.msra.mxu0 %v559_v16  ;;  %1668 = vmatpush1.bf16.msra.mxu1 %v561_v17  ;;  %v601_v16 = vunpack.c.h.s8.bf16 %v237_v8  ;;  %v604_v17 = vunpack.c.l.s8.bf16 %v240_v13 }
  0x7a   :  { %1259 = vmatprep.subr.bf16.mxu0 %v564_v18  ;;  %1669 = vmatprep.subr.bf16.mxu1 %v566_v19  ;;  %v606_v18 = vunpack.c.l.s8.bf16 %v242_v14  ;;  %v239_v19 = vld [vmem:[#allocation3 + $0x160] sm:$0xff] }
  0x7d   :  { %1260 = vmatpush1.bf16.msra.mxu0 %v563_v20  ;;  %1670 = vmatpush1.bf16.msra.mxu1 %v565_v21  ;;  %v241_v20 = vld [vmem:[#allocation3 + $0x170] sm:$0xff]  ;;  %v603_v21 = vunpack.c.l.s8.bf16 %v239_v19 }
  0x7e   :  { %1261 = vmatprep.subr.bf16.mxu0 %v568_v22  ;;  %1671 = vmatprep.subr.bf16.mxu1 %v570_v23  ;;  %v605_v22 = vunpack.c.l.s8.bf16 %v241_v20  ;;  %v608_v23 = vunpack.c.h.s8.bf16 %v240_v13  ;;  %v262_v13 = vld [vmem:[#allocation3 + $0x218] sm:$0xff] }
  0x81   :  { %1262 = vmatpush1.bf16.msra.mxu0 %v567_v26  ;;  %1672 = vmatpush1.bf16.msra.mxu1 %v569_v27  ;;  %v246_v26 = vld [vmem:[#allocation3 + $0x198] sm:$0xff]  ;;  %v607_v27 = vunpack.c.h.s8.bf16 %v239_v19  ;;  %v261_v19 = vld [vmem:[#allocation3 + $0x210] sm:$0xff] }
  0x82   :  { %1263 = vmatprep.subr.bf16.mxu0 %v572_v28  ;;  %1673 = vmatprep.subr.bf16.mxu1 %v574_v29  ;;  %v609_v28 = vunpack.c.h.s8.bf16 %v241_v20  ;;  %v612_v29 = vunpack.c.l.s8.bf16 %v244_v25  ;;  %v614_v30 = vunpack.c.l.s8.bf16 %v246_v26  ;;  %v618_v37 = vunpack.c.h.s8.bf16 %v246_v26  ;;  %v2938_v20 = vld [vmem:[%s3040_s0 + $0x30] sm:$0xff] }
  0x83   :  { %v650_v26 = vunpack.c.h.s8.bf16 %v262_v13 }
  0x85   :  { %1264 = vmatpush1.bf16.msra.mxu0 %v571_v33  ;;  %1674 = vmatpush1.bf16.msra.mxu1 %v573_v34  ;;  %v245_v33 = vld [vmem:[#allocation3 + $0x190] sm:$0xff]  ;;  %v611_v34 = vunpack.c.l.s8.bf16 %v243_v32 }
  0x86   :  { %1265 = vmatprep.subr.bf16.mxu0 %v576_v35  ;;  %1675 = vmatprep.subr.bf16.mxu1 %v578_v36  ;;  %v613_v35 = vunpack.c.l.s8.bf16 %v245_v33  ;;  %v616_v36 = vunpack.c.h.s8.bf16 %v244_v25 }
  0x89   :  { %1266 = vmatpush1.bf16.msra.mxu0 %v575_v39  ;;  %1676 = vmatpush1.bf16.msra.mxu1 %v577_v40  ;;  %v250_v39 = vld [vmem:[#allocation3 + $0x1b8] sm:$0xff]  ;;  %v615_v40 = vunpack.c.h.s8.bf16 %v243_v32  ;;  %v649_v32 = vunpack.c.h.s8.bf16 %v261_v19 }
  0x8a   :  { %1276 = vmatprep.subr.bf16.mxu0 %v580_v41  ;;  %1686 = vmatprep.subr.bf16.mxu1 %v582_v42  ;;  %v617_v41 = vunpack.c.h.s8.bf16 %v245_v33  ;;  %v620_v42 = vunpack.c.l.s8.bf16 %v248_v38  ;;  %v622_v43 = vunpack.c.l.s8.bf16 %v250_v39 }
  0x8c   :  { %1268 = vmatmul.mubr.bf16.vlgmr.msra.gmra.mrb[0].mxu0 %v2691_v47  ;;  %1678 = vmatmul.mubr.bf16.vlgmr.msra.gmra.mrb[0].mxu1 %v2691_v47  ;;  %v249_v47 = vld [vmem:[#allocation3 + $0x1b0] sm:$0xff] }
  0x8d   :  { %1277 = vmatpush1.bf16.msra.mxu0 %v579_v48  ;;  %1687 = vmatpush1.bf16.msra.mxu1 %v581_v49  ;;  %v619_v48 = vunpack.c.l.s8.bf16 %v247_v44  ;;  %v621_v49 = vunpack.c.l.s8.bf16 %v249_v47 }
  0x8e   :  { %1278 = vmatprep.subr.bf16.mxu0 %v584_v50  ;;  %1688 = vmatprep.subr.bf16.mxu1 %v586_v51  ;;  %v624_v50 = vunpack.c.h.s8.bf16 %v248_v38  ;;  %v626_v51 = vunpack.c.h.s8.bf16 %v250_v39  ;;  %v268_v39 = vld [vmem:[#allocation3 + $0x248] sm:$0xff] }
  0x8f   :  { %1308 = vmatprep.mubr.bf16.mxu0 %v2692_v54  ;;  %1718 = vmatprep.mubr.bf16.mxu1 %v2692_v54  ;;  %v623_v54 = vunpack.c.h.s8.bf16 %v247_v44 }
  0x91   :  { %1279 = vmatpush1.bf16.msra.mxu0 %v583_v55  ;;  %1689 = vmatpush1.bf16.msra.mxu1 %v585_v58  ;;  %v625_v55 = vunpack.c.h.s8.bf16 %v249_v47  ;;  %v628_v58 = vunpack.c.l.s8.bf16 %v252_v52  ;;  %v267_v47 = vld [vmem:[#allocation3 + $0x240] sm:$0xff] }
  0x92   :  { %1280 = vmatprep.subr.bf16.mxu0 %v588_v31  ;;  %1690 = vmatprep.subr.bf16.mxu1 %v590_v59  ;;  %v630_v31 = vunpack.c.l.s8.bf16 %v254_v53  ;;  %v251_v59 = vld [vmem:[#allocation3 + $0x1c0] sm:$0xff] }
  0x93   :  { %v627_v61 = vunpack.c.l.s8.bf16 %v251_v59  ;;  %v631_v2 = vunpack.c.h.s8.bf16 %v251_v59 }
  0x95   :  { %1281 = vmatpush1.bf16.msra.mxu0 %v587_v62  ;;  %1691 = vmatpush1.bf16.msra.mxu1 %v589_v63  ;;  %v629_v62 = vunpack.c.l.s8.bf16 %v253_v60  ;;  %v632_v63 = vunpack.c.h.s8.bf16 %v252_v52 }
  0x96   :  { %1282 = vmatprep.subr.bf16.mxu0 %v592_v57  ;;  %1692 = vmatprep.subr.bf16.mxu1 %v594_v0  ;;  %v634_v57 = vunpack.c.h.s8.bf16 %v254_v53  ;;  %v256_v0 = vld [vmem:[#allocation3 + $0x1e8] sm:$0xff] }
  0x97   :  { %v272_v53 = vld [vmem:[#allocation3 + $0x268] sm:$0xff] }
  0x99   :  { %1283 = vmatpush1.bf16.msra.mxu0 %v591_v3  ;;  %1693 = vmatpush1.bf16.msra.mxu1 %v593_v4  ;;  %v633_v3 = vunpack.c.h.s8.bf16 %v253_v60  ;;  %v636_v4 = vunpack.c.l.s8.bf16 %v256_v0  ;;  %v271_v60 = vld [vmem:[#allocation3 + $0x260] sm:$0xff] }
  0x9a   :  { %1284 = vmatprep.subr.bf16.mxu0 %v596_v5  ;;  %1694 = vmatprep.subr.bf16.mxu1 %v598_v6  ;;  %v638_v5 = vunpack.c.l.s8.bf16 %v258_v1  ;;  %v255_v6 = vld [vmem:[#allocation3 + $0x1e0] sm:$0xff] }
  0x9b   :  { %v635_v8 = vunpack.c.l.s8.bf16 %v255_v6  ;;  %v639_v14 = vunpack.c.h.s8.bf16 %v255_v6 }
  0x9d   :  { %1285 = vmatpush1.bf16.msra.mxu0 %v595_v9  ;;  %1695 = vmatpush1.bf16.msra.mxu1 %v597_v10  ;;  %v637_v9 = vunpack.c.l.s8.bf16 %v257_v7  ;;  %v640_v10 = vunpack.c.h.s8.bf16 %v256_v0 }
  0x9e   :  { %1286 = vmatprep.subr.bf16.mxu0 %v600_v11  ;;  %1696 = vmatprep.subr.bf16.mxu1 %v602_v12  ;;  %v642_v11 = vunpack.c.h.s8.bf16 %v258_v1  ;;  %v260_v12 = vld [vmem:[#allocation3 + $0x208] sm:$0xff] }
  0x9f   :  { %v648_v25 = vunpack.c.h.s8.bf16 %v260_v12  ;;  %v276_v1 = vld [vmem:[#allocation3 + $0x288] sm:$0xff] }
  0xa1   :  { %1287 = vmatpush1.bf16.msra.mxu0 %v599_v15  ;;  %1697 = vmatpush1.bf16.msra.mxu1 %v601_v16  ;;  %v641_v15 = vunpack.c.h.s8.bf16 %v257_v7  ;;  %v644_v16 = vunpack.c.l.s8.bf16 %v260_v12  ;;  %v275_v7 = vld [vmem:[#allocation3 + $0x280] sm:$0xff] }
  0xa2   :  { %1288 = vmatprep.subr.bf16.mxu0 %v604_v17  ;;  %1698 = vmatprep.subr.bf16.mxu1 %v606_v18  ;;  %v646_v17 = vunpack.c.l.s8.bf16 %v262_v13  ;;  %v259_v18 = vld [vmem:[#allocation3 + $0x200] sm:$0xff]  ;;  %v280_v13 = vld [vmem:[#allocation3 + $0x2a8] sm:$0xff] }
  0xa5   :  { %1289 = vmatpush1.bf16.msra.mxu0 %v603_v21  ;;  %1699 = vmatpush1.bf16.msra.mxu1 %v605_v22  ;;  %v2943_v21 = vld [vmem:[%s3040_s0 + $0x38] sm:$0xff]  ;;  %v2693_v22 = vpack.c.bf16 %v2914_v56, %v2914_v56 }
  0xa6   :  { %1290 = vmatprep.subr.bf16.mxu0 %v608_v23  ;;  %1700 = vmatprep.subr.bf16.mxu1 %v610_v24  ;;  %v643_v23 = vunpack.c.l.s8.bf16 %v259_v18  ;;  %v645_v24 = vunpack.c.l.s8.bf16 %v261_v19  ;;  %v279_v19 = vld [vmem:[#allocation3 + $0x2a0] sm:$0xff] }
  0xa9   :  { %1291 = vmatpush1.bf16.msra.mxu0 %v607_v27  ;;  %1701 = vmatpush1.bf16.msra.mxu1 %v609_v28  ;;  %v264_v27 = vld [vmem:[#allocation3 + $0x228] sm:$0xff]  ;;  %v266_v28 = vld [vmem:[#allocation3 + $0x238] sm:$0xff] }
  0xaa   :  { %1292 = vmatprep.subr.bf16.mxu0 %v612_v29  ;;  %1702 = vmatprep.subr.bf16.mxu1 %v614_v30  ;;  %v2694_v29 = vpack.c.bf16 %v2929_v46, %v2929_v46  ;;  %v647_v30 = vunpack.c.h.s8.bf16 %v259_v18  ;;  %v652_v56 = vunpack.c.l.s8.bf16 %v264_v27  ;;  %v654_v33 = vunpack.c.l.s8.bf16 %v266_v28 }
  0xab   :  { %v656_v46 = vunpack.c.h.s8.bf16 %v264_v27  ;;  %v658_v38 = vunpack.c.h.s8.bf16 %v266_v28  ;;  %v284_v27 = vld [vmem:[#allocation3 + $0x2c8] sm:$0xff]  ;;  %v286_v28 = vld [vmem:[#allocation3 + $0x2d8] sm:$0xff] }
  0xad   :  { %1293 = vmatpush1.bf16.msra.mxu0 %v611_v34  ;;  %1703 = vmatpush1.bf16.msra.mxu1 %v613_v35  ;;  %v263_v34 = vld [vmem:[#allocation3 + $0x220] sm:$0xff]  ;;  %v265_v35 = vld [vmem:[#allocation3 + $0x230] sm:$0xff] }
  0xae   :  { %1294 = vmatprep.subr.bf16.mxu0 %v616_v36  ;;  %1704 = vmatprep.subr.bf16.mxu1 %v618_v37  ;;  %v651_v36 = vunpack.c.l.s8.bf16 %v263_v34  ;;  %v653_v37 = vunpack.c.l.s8.bf16 %v265_v35 }
  0xb1   :  { %1295 = vmatpush1.bf16.msra.mxu0 %v615_v40  ;;  %1705 = vmatpush1.bf16.msra.mxu1 %v617_v41  ;;  %v270_v40 = vld [vmem:[#allocation3 + $0x258] sm:$0xff]  ;;  %v655_v41 = vunpack.c.h.s8.bf16 %v263_v34  ;;  %v285_v34 = vld [vmem:[#allocation3 + $0x2d0] sm:$0xff] }
  0xb2   :  { %1296 = vmatprep.subr.bf16.mxu0 %v620_v42  ;;  %1706 = vmatprep.subr.bf16.mxu1 %v622_v43  ;;  %v657_v42 = vunpack.c.h.s8.bf16 %v265_v35  ;;  %v660_v43 = vunpack.c.l.s8.bf16 %v268_v39  ;;  %v662_v44 = vunpack.c.l.s8.bf16 %v270_v40  ;;  %v666_v52 = vunpack.c.h.s8.bf16 %v270_v40 }
  0xb5   :  { %1297 = vmatpush1.bf16.msra.mxu0 %v619_v48  ;;  %1707 = vmatpush1.bf16.msra.mxu1 %v621_v49  ;;  %v269_v48 = vld [vmem:[#allocation3 + $0x250] sm:$0xff]  ;;  %v659_v49 = vunpack.c.l.s8.bf16 %v267_v47 }
  0xb6   :  { %1298 = vmatprep.subr.bf16.mxu0 %v624_v50  ;;  %1708 = vmatprep.subr.bf16.mxu1 %v626_v51  ;;  %v661_v50 = vunpack.c.l.s8.bf16 %v269_v48  ;;  %v664_v51 = vunpack.c.h.s8.bf16 %v268_v39  ;;  %v290_v39 = vld [vmem:[#allocation3 + $0x2f8] sm:$0xff] }
  0xb9   :  { %1299 = vmatpush1.bf16.msra.mxu0 %v623_v54  ;;  %1709 = vmatpush1.bf16.msra.mxu1 %v625_v55  ;;  %v274_v54 = vld [vmem:[#allocation3 + $0x278] sm:$0xff]  ;;  %v663_v55 = vunpack.c.h.s8.bf16 %v267_v47  ;;  %v289_v47 = vld [vmem:[#allocation3 + $0x2f0] sm:$0xff] }
  0xba   :  { %1300 = vmatprep.subr.bf16.mxu0 %v628_v58  ;;  %1710 = vmatprep.subr.bf16.mxu1 %v630_v31  ;;  %v665_v58 = vunpack.c.h.s8.bf16 %v269_v48  ;;  %v668_v31 = vunpack.c.l.s8.bf16 %v272_v53  ;;  %v670_v59 = vunpack.c.l.s8.bf16 %v274_v54  ;;  %v674_v0 = vunpack.c.h.s8.bf16 %v274_v54 }
  0xbd   :  { %1301 = vmatpush1.bf16.msra.mxu0 %v627_v61  ;;  %1711 = vmatpush1.bf16.msra.mxu1 %v629_v62  ;;  %v273_v61 = vld [vmem:[#allocation3 + $0x270] sm:$0xff]  ;;  %v667_v62 = vunpack.c.l.s8.bf16 %v271_v60 }
  0xbe   :  { %1302 = vmatprep.subr.bf16.mxu0 %v632_v63  ;;  %1712 = vmatprep.subr.bf16.mxu1 %v634_v57  ;;  %v669_v63 = vunpack.c.l.s8.bf16 %v273_v61  ;;  %v672_v57 = vunpack.c.h.s8.bf16 %v272_v53  ;;  %v294_v53 = vld [vmem:[#allocation3 + $0x318] sm:$0xff] }
  0xc1   :  { %1303 = vmatpush1.bf16.msra.mxu0 %v631_v2  ;;  %1713 = vmatpush1.bf16.msra.mxu1 %v633_v3  ;;  %v278_v2 = vld [vmem:[#allocation3 + $0x298] sm:$0xff]  ;;  %v671_v3 = vunpack.c.h.s8.bf16 %v271_v60  ;;  %v293_v60 = vld [vmem:[#allocation3 + $0x310] sm:$0xff] }
  0xc2   :  { %1304 = vmatprep.subr.bf16.mxu0 %v636_v4  ;;  %1714 = vmatprep.subr.bf16.mxu1 %v638_v5  ;;  %v673_v4 = vunpack.c.h.s8.bf16 %v273_v61  ;;  %v676_v5 = vunpack.c.l.s8.bf16 %v276_v1  ;;  %v678_v6 = vunpack.c.l.s8.bf16 %v278_v2  ;;  %v682_v12 = vunpack.c.h.s8.bf16 %v278_v2  ;;  %v2952_v61 = vld [vmem:[%s3040_s0 + $0x40] sm:$0xff] }
  0xc3   :  { %v714_v2 = vunpack.c.h.s8.bf16 %v294_v53 }
  0xc5   :  { %1305 = vmatpush1.bf16.msra.mxu0 %v635_v8  ;;  %1715 = vmatpush1.bf16.msra.mxu1 %v637_v9  ;;  %v277_v8 = vld [vmem:[#allocation3 + $0x290] sm:$0xff]  ;;  %v675_v9 = vunpack.c.l.s8.bf16 %v275_v7 }
  0xc6   :  { %1306 = vmatprep.subr.bf16.mxu0 %v640_v10  ;;  %1716 = vmatprep.subr.bf16.mxu1 %v642_v11  ;;  %v677_v10 = vunpack.c.l.s8.bf16 %v277_v8  ;;  %v680_v11 = vunpack.c.h.s8.bf16 %v276_v1 }
  0xc9   :  { %1307 = vmatpush1.bf16.msra.mxu0 %v639_v14  ;;  %1717 = vmatpush1.bf16.msra.mxu1 %v641_v15  ;;  %v282_v14 = vld [vmem:[#allocation3 + $0x2b8] sm:$0xff]  ;;  %v679_v15 = vunpack.c.h.s8.bf16 %v275_v7  ;;  %v713_v7 = vunpack.c.h.s8.bf16 %v293_v60 }
  0xca   :  { %1317 = vmatprep.subr.bf16.mxu0 %v644_v16  ;;  %1727 = vmatprep.subr.bf16.mxu1 %v646_v17  ;;  %v681_v16 = vunpack.c.h.s8.bf16 %v277_v8  ;;  %v684_v17 = vunpack.c.l.s8.bf16 %v280_v13  ;;  %v686_v18 = vunpack.c.l.s8.bf16 %v282_v14 }
  0xcc   :  { %1309 = vmatmul.mubr.bf16.vlgmr.msra.gmra.mrb[0].mxu0 %v2693_v22  ;;  %1719 = vmatmul.mubr.bf16.vlgmr.msra.gmra.mrb[0].mxu1 %v2693_v22  ;;  %v281_v22 = vld [vmem:[#allocation3 + $0x2b0] sm:$0xff] }
  0xcd   :  { %1318 = vmatpush1.bf16.msra.mxu0 %v643_v23  ;;  %1728 = vmatpush1.bf16.msra.mxu1 %v645_v24  ;;  %v683_v23 = vunpack.c.l.s8.bf16 %v279_v19  ;;  %v685_v24 = vunpack.c.l.s8.bf16 %v281_v22 }
  0xce   :  { %1319 = vmatprep.subr.bf16.mxu0 %v648_v25  ;;  %1729 = vmatprep.subr.bf16.mxu1 %v650_v26  ;;  %v688_v25 = vunpack.c.h.s8.bf16 %v280_v13  ;;  %v690_v26 = vunpack.c.h.s8.bf16 %v282_v14  ;;  %v300_v14 = vld [vmem:[#allocation3 + $0x348] sm:$0xff] }
  0xcf   :  { %1349 = vmatprep.mubr.bf16.mxu0 %v2694_v29  ;;  %1759 = vmatprep.mubr.bf16.mxu1 %v2694_v29  ;;  %v687_v29 = vunpack.c.h.s8.bf16 %v279_v19 }
  0xd1   :  { %1320 = vmatpush1.bf16.msra.mxu0 %v647_v30  ;;  %1730 = vmatpush1.bf16.msra.mxu1 %v649_v32  ;;  %v689_v30 = vunpack.c.h.s8.bf16 %v281_v22  ;;  %v692_v32 = vunpack.c.l.s8.bf16 %v284_v27  ;;  %v299_v22 = vld [vmem:[#allocation3 + $0x340] sm:$0xff] }
  0xd2   :  { %1321 = vmatprep.subr.bf16.mxu0 %v652_v56  ;;  %1731 = vmatprep.subr.bf16.mxu1 %v654_v33  ;;  %v694_v56 = vunpack.c.l.s8.bf16 %v286_v28  ;;  %v283_v33 = vld [vmem:[#allocation3 + $0x2c0] sm:$0xff] }
  0xd3   :  { %v691_v35 = vunpack.c.l.s8.bf16 %v283_v33  ;;  %v695_v40 = vunpack.c.h.s8.bf16 %v283_v33 }
  0xd5   :  { %1322 = vmatpush1.bf16.msra.mxu0 %v651_v36  ;;  %1732 = vmatpush1.bf16.msra.mxu1 %v653_v37  ;;  %v693_v36 = vunpack.c.l.s8.bf16 %v285_v34  ;;  %v696_v37 = vunpack.c.h.s8.bf16 %v284_v27 }
  0xd6   :  { %1323 = vmatprep.subr.bf16.mxu0 %v656_v46  ;;  %1733 = vmatprep.subr.bf16.mxu1 %v658_v38  ;;  %v698_v46 = vunpack.c.h.s8.bf16 %v286_v28  ;;  %v288_v38 = vld [vmem:[#allocation3 + $0x2e8] sm:$0xff] }
  0xd7   :  { %v304_v28 = vld [vmem:[#allocation3 + $0x368] sm:$0xff] }
  0xd9   :  { %1324 = vmatpush1.bf16.msra.mxu0 %v655_v41  ;;  %1734 = vmatpush1.bf16.msra.mxu1 %v657_v42  ;;  %v697_v41 = vunpack.c.h.s8.bf16 %v285_v34  ;;  %v700_v42 = vunpack.c.l.s8.bf16 %v288_v38  ;;  %v303_v34 = vld [vmem:[#allocation3 + $0x360] sm:$0xff] }
  0xda   :  { %1325 = vmatprep.subr.bf16.mxu0 %v660_v43  ;;  %1735 = vmatprep.subr.bf16.mxu1 %v662_v44  ;;  %v702_v43 = vunpack.c.l.s8.bf16 %v290_v39  ;;  %v287_v44 = vld [vmem:[#allocation3 + $0x2e0] sm:$0xff] }
  0xdb   :  { %v699_v48 = vunpack.c.l.s8.bf16 %v287_v44  ;;  %v703_v54 = vunpack.c.h.s8.bf16 %v287_v44 }
  0xdd   :  { %1326 = vmatpush1.bf16.msra.mxu0 %v659_v49  ;;  %1736 = vmatpush1.bf16.msra.mxu1 %v661_v50  ;;  %v701_v49 = vunpack.c.l.s8.bf16 %v289_v47  ;;  %v704_v50 = vunpack.c.h.s8.bf16 %v288_v38 }
  0xde   :  { %1327 = vmatprep.subr.bf16.mxu0 %v664_v51  ;;  %1737 = vmatprep.subr.bf16.mxu1 %v666_v52  ;;  %v706_v51 = vunpack.c.h.s8.bf16 %v290_v39  ;;  %v292_v52 = vld [vmem:[#allocation3 + $0x308] sm:$0xff] }
  0xdf   :  { %v712_v1 = vunpack.c.h.s8.bf16 %v292_v52  ;;  %v308_v39 = vld [vmem:[#allocation3 + $0x388] sm:$0xff] }
  0xe1   :  { %1328 = vmatpush1.bf16.msra.mxu0 %v663_v55  ;;  %1738 = vmatpush1.bf16.msra.mxu1 %v665_v58  ;;  %v705_v55 = vunpack.c.h.s8.bf16 %v289_v47  ;;  %v708_v58 = vunpack.c.l.s8.bf16 %v292_v52  ;;  %v307_v47 = vld [vmem:[#allocation3 + $0x380] sm:$0xff] }
  0xe2   :  { %1329 = vmatprep.subr.bf16.mxu0 %v668_v31  ;;  %1739 = vmatprep.subr.bf16.mxu1 %v670_v59  ;;  %v710_v31 = vunpack.c.l.s8.bf16 %v294_v53  ;;  %v291_v59 = vld [vmem:[#allocation3 + $0x300] sm:$0xff]  ;;  %v312_v53 = vld [vmem:[#allocation3 + $0x3a8] sm:$0xff] }
  0xe5   :  { %1330 = vmatpush1.bf16.msra.mxu0 %v667_v62  ;;  %1740 = vmatpush1.bf16.msra.mxu1 %v669_v63  ;;  %v2957_v62 = vld [vmem:[%s3040_s0 + $0x48] sm:$0xff]  ;;  %v2695_v63 = vpack.c.bf16 %v2924_v45, %v2924_v45 }
  0xe6   :  { %1331 = vmatprep.subr.bf16.mxu0 %v672_v57  ;;  %1741 = vmatprep.subr.bf16.mxu1 %v674_v0  ;;  %v707_v57 = vunpack.c.l.s8.bf16 %v291_v59  ;;  %v709_v0 = vunpack.c.l.s8.bf16 %v293_v60  ;;  %v311_v60 = vld [vmem:[#allocation3 + $0x3a0] sm:$0xff] }
  0xe9   :  { %1332 = vmatpush1.bf16.msra.mxu0 %v671_v3  ;;  %1742 = vmatpush1.bf16.msra.mxu1 %v673_v4  ;;  %v296_v3 = vld [vmem:[#allocation3 + $0x328] sm:$0xff]  ;;  %v298_v4 = vld [vmem:[#allocation3 + $0x338] sm:$0xff] }
  0xea   :  { %1333 = vmatprep.subr.bf16.mxu0 %v676_v5  ;;  %1743 = vmatprep.subr.bf16.mxu1 %v678_v6  ;;  %v2696_v5 = vpack.c.bf16 %v2943_v21, %v2943_v21  ;;  %v711_v6 = vunpack.c.h.s8.bf16 %v291_v59  ;;  %v716_v45 = vunpack.c.l.s8.bf16 %v296_v3  ;;  %v718_v8 = vunpack.c.l.s8.bf16 %v298_v4 }
  0xeb   :  { %v720_v21 = vunpack.c.h.s8.bf16 %v296_v3  ;;  %v722_v13 = vunpack.c.h.s8.bf16 %v298_v4  ;;  %v316_v3 = vld [vmem:[#allocation3 + $0x3c8] sm:$0xff]  ;;  %v318_v4 = vld [vmem:[#allocation3 + $0x3d8] sm:$0xff] }
  0xed   :  { %1334 = vmatpush1.bf16.msra.mxu0 %v675_v9  ;;  %1744 = vmatpush1.bf16.msra.mxu1 %v677_v10  ;;  %v295_v9 = vld [vmem:[#allocation3 + $0x320] sm:$0xff]  ;;  %v297_v10 = vld [vmem:[#allocation3 + $0x330] sm:$0xff] }
  0xee   :  { %1335 = vmatprep.subr.bf16.mxu0 %v680_v11  ;;  %1745 = vmatprep.subr.bf16.mxu1 %v682_v12  ;;  %v715_v11 = vunpack.c.l.s8.bf16 %v295_v9  ;;  %v717_v12 = vunpack.c.l.s8.bf16 %v297_v10 }
  0xf1   :  { %1336 = vmatpush1.bf16.msra.mxu0 %v679_v15  ;;  %1746 = vmatpush1.bf16.msra.mxu1 %v681_v16  ;;  %v302_v15 = vld [vmem:[#allocation3 + $0x358] sm:$0xff]  ;;  %v719_v16 = vunpack.c.h.s8.bf16 %v295_v9  ;;  %v317_v9 = vld [vmem:[#allocation3 + $0x3d0] sm:$0xff] }
  0xf2   :  { %1337 = vmatprep.subr.bf16.mxu0 %v684_v17  ;;  %1747 = vmatprep.subr.bf16.mxu1 %v686_v18  ;;  %v721_v17 = vunpack.c.h.s8.bf16 %v297_v10  ;;  %v724_v18 = vunpack.c.l.s8.bf16 %v300_v14  ;;  %v726_v19 = vunpack.c.l.s8.bf16 %v302_v15  ;;  %v730_v27 = vunpack.c.h.s8.bf16 %v302_v15 }
  0xf5   :  { %1338 = vmatpush1.bf16.msra.mxu0 %v683_v23  ;;  %1748 = vmatpush1.bf16.msra.mxu1 %v685_v24  ;;  %v301_v23 = vld [vmem:[#allocation3 + $0x350] sm:$0xff]  ;;  %v723_v24 = vunpack.c.l.s8.bf16 %v299_v22 }
  0xf6   :  { %1339 = vmatprep.subr.bf16.mxu0 %v688_v25  ;;  %1749 = vmatprep.subr.bf16.mxu1 %v690_v26  ;;  %v725_v25 = vunpack.c.l.s8.bf16 %v301_v23  ;;  %v728_v26 = vunpack.c.h.s8.bf16 %v300_v14  ;;  %v322_v14 = vld [vmem:[#allocation3 + $0x3f8] sm:$0xff] }
  0xf9   :  { %1340 = vmatpush1.bf16.msra.mxu0 %v687_v29  ;;  %1750 = vmatpush1.bf16.msra.mxu1 %v689_v30  ;;  %v306_v29 = vld [vmem:[#allocation3 + $0x378] sm:$0xff]  ;;  %v727_v30 = vunpack.c.h.s8.bf16 %v299_v22  ;;  %v321_v22 = vld [vmem:[#allocation3 + $0x3f0] sm:$0xff] }
  0xfa   :  { %1341 = vmatprep.subr.bf16.mxu0 %v692_v32  ;;  %1751 = vmatprep.subr.bf16.mxu1 %v694_v56  ;;  %v729_v32 = vunpack.c.h.s8.bf16 %v301_v23  ;;  %v732_v56 = vunpack.c.l.s8.bf16 %v304_v28  ;;  %v734_v33 = vunpack.c.l.s8.bf16 %v306_v29  ;;  %v738_v38 = vunpack.c.h.s8.bf16 %v306_v29 }
  0xfd   :  { %1342 = vmatpush1.bf16.msra.mxu0 %v691_v35  ;;  %1752 = vmatpush1.bf16.msra.mxu1 %v693_v36  ;;  %v305_v35 = vld [vmem:[#allocation3 + $0x370] sm:$0xff]  ;;  %v731_v36 = vunpack.c.l.s8.bf16 %v303_v34 }
  0xfe   :  { %1343 = vmatprep.subr.bf16.mxu0 %v696_v37  ;;  %1753 = vmatprep.subr.bf16.mxu1 %v698_v46  ;;  %v733_v37 = vunpack.c.l.s8.bf16 %v305_v35  ;;  %v736_v46 = vunpack.c.h.s8.bf16 %v304_v28  ;;  %v326_v28 = vld [vmem:[#allocation3 + $0x418] sm:$0xff] }
 0x101   :  { %1344 = vmatpush1.bf16.msra.mxu0 %v695_v40  ;;  %1754 = vmatpush1.bf16.msra.mxu1 %v697_v41  ;;  %v310_v40 = vld [vmem:[#allocation3 + $0x398] sm:$0xff]  ;;  %v735_v41 = vunpack.c.h.s8.bf16 %v303_v34  ;;  %v325_v34 = vld [vmem:[#allocation3 + $0x410] sm:$0xff] }
 0x102   :  { %1345 = vmatprep.subr.bf16.mxu0 %v700_v42  ;;  %1755 = vmatprep.subr.bf16.mxu1 %v702_v43  ;;  %v737_v42 = vunpack.c.h.s8.bf16 %v305_v35  ;;  %v740_v43 = vunpack.c.l.s8.bf16 %v308_v39  ;;  %v742_v44 = vunpack.c.l.s8.bf16 %v310_v40  ;;  %v746_v52 = vunpack.c.h.s8.bf16 %v310_v40  ;;  %v2966_v35 = vld [vmem:[%s3040_s0 + $0x50] sm:$0xff] }
 0x103   :  { %v778_v40 = vunpack.c.h.s8.bf16 %v326_v28 }
 0x105   :  { %1346 = vmatpush1.bf16.msra.mxu0 %v699_v48  ;;  %1756 = vmatpush1.bf16.msra.mxu1 %v701_v49  ;;  %v309_v48 = vld [vmem:[#allocation3 + $0x390] sm:$0xff]  ;;  %v739_v49 = vunpack.c.l.s8.bf16 %v307_v47 }
 0x106   :  { %1347 = vmatprep.subr.bf16.mxu0 %v704_v50  ;;  %1757 = vmatprep.subr.bf16.mxu1 %v706_v51  ;;  %v741_v50 = vunpack.c.l.s8.bf16 %v309_v48  ;;  %v744_v51 = vunpack.c.h.s8.bf16 %v308_v39 }
 0x109   :  { %1348 = vmatpush1.bf16.msra.mxu0 %v703_v54  ;;  %1758 = vmatpush1.bf16.msra.mxu1 %v705_v55  ;;  %v314_v54 = vld [vmem:[#allocation3 + $0x3b8] sm:$0xff]  ;;  %v743_v55 = vunpack.c.h.s8.bf16 %v307_v47  ;;  %v777_v47 = vunpack.c.h.s8.bf16 %v325_v34 }
 0x10a   :  { %1358 = vmatprep.subr.bf16.mxu0 %v708_v58  ;;  %1768 = vmatprep.subr.bf16.mxu1 %v710_v31  ;;  %v745_v58 = vunpack.c.h.s8.bf16 %v309_v48  ;;  %v748_v31 = vunpack.c.l.s8.bf16 %v312_v53  ;;  %v750_v59 = vunpack.c.l.s8.bf16 %v314_v54 }
 0x10c   :  { %1350 = vmatmul.mubr.bf16.vlgmr.msra.gmra.mrb[0].mxu0 %v2695_v63  ;;  %1760 = vmatmul.mubr.bf16.vlgmr.msra.gmra.mrb[0].mxu1 %v2695_v63  ;;  %v313_v63 = vld [vmem:[#allocation3 + $0x3b0] sm:$0xff] }
 0x10d   :  { %1359 = vmatpush1.bf16.msra.mxu0 %v707_v57  ;;  %1769 = vmatpush1.bf16.msra.mxu1 %v709_v0  ;;  %v747_v57 = vunpack.c.l.s8.bf16 %v311_v60  ;;  %v749_v0 = vunpack.c.l.s8.bf16 %v313_v63 }
 0x10e   :  { %1360 = vmatprep.subr.bf16.mxu0 %v712_v1  ;;  %1770 = vmatprep.subr.bf16.mxu1 %v714_v2  ;;  %v752_v1 = vunpack.c.h.s8.bf16 %v312_v53  ;;  %v754_v2 = vunpack.c.h.s8.bf16 %v314_v54  ;;  %v332_v54 = vld [vmem:[#allocation3 + $0x448] sm:$0xff] }
 0x10f   :  { %1390 = vmatprep.mubr.bf16.mxu0 %v2696_v5  ;;  %1800 = vmatprep.mubr.bf16.mxu1 %v2696_v5  ;;  %v751_v5 = vunpack.c.h.s8.bf16 %v311_v60 }
 0x111   :  { %1361 = vmatpush1.bf16.msra.mxu0 %v711_v6  ;;  %1771 = vmatpush1.bf16.msra.mxu1 %v713_v7  ;;  %v753_v6 = vunpack.c.h.s8.bf16 %v313_v63  ;;  %v756_v7 = vunpack.c.l.s8.bf16 %v316_v3  ;;  %v331_v63 = vld [vmem:[#allocation3 + $0x440] sm:$0xff] }
 0x112   :  { %1362 = vmatprep.subr.bf16.mxu0 %v716_v45  ;;  %1772 = vmatprep.subr.bf16.mxu1 %v718_v8  ;;  %v758_v45 = vunpack.c.l.s8.bf16 %v318_v4  ;;  %v315_v8 = vld [vmem:[#allocation3 + $0x3c0] sm:$0xff] }
 0x113   :  { %v755_v10 = vunpack.c.l.s8.bf16 %v315_v8  ;;  %v759_v15 = vunpack.c.h.s8.bf16 %v315_v8 }
 0x115   :  { %1363 = vmatpush1.bf16.msra.mxu0 %v715_v11  ;;  %1773 = vmatpush1.bf16.msra.mxu1 %v717_v12  ;;  %v757_v11 = vunpack.c.l.s8.bf16 %v317_v9  ;;  %v760_v12 = vunpack.c.h.s8.bf16 %v316_v3 }
 0x116   :  { %1364 = vmatprep.subr.bf16.mxu0 %v720_v21  ;;  %1774 = vmatprep.subr.bf16.mxu1 %v722_v13  ;;  %v762_v21 = vunpack.c.h.s8.bf16 %v318_v4  ;;  %v320_v13 = vld [vmem:[#allocation3 + $0x3e8] sm:$0xff] }
 0x117   :  { %v336_v4 = vld [vmem:[#allocation3 + $0x468] sm:$0xff] }
 0x119   :  { %1365 = vmatpush1.bf16.msra.mxu0 %v719_v16  ;;  %1775 = vmatpush1.bf16.msra.mxu1 %v721_v17  ;;  %v761_v16 = vunpack.c.h.s8.bf16 %v317_v9  ;;  %v764_v17 = vunpack.c.l.s8.bf16 %v320_v13  ;;  %v335_v9 = vld [vmem:[#allocation3 + $0x460] sm:$0xff] }
 0x11a   :  { %1366 = vmatprep.subr.bf16.mxu0 %v724_v18  ;;  %1776 = vmatprep.subr.bf16.mxu1 %v726_v19  ;;  %v766_v18 = vunpack.c.l.s8.bf16 %v322_v14  ;;  %v319_v19 = vld [vmem:[#allocation3 + $0x3e0] sm:$0xff] }
 0x11b   :  { %v763_v23 = vunpack.c.l.s8.bf16 %v319_v19  ;;  %v767_v29 = vunpack.c.h.s8.bf16 %v319_v19 }
 0x11d   :  { %1367 = vmatpush1.bf16.msra.mxu0 %v723_v24  ;;  %1777 = vmatpush1.bf16.msra.mxu1 %v725_v25  ;;  %v765_v24 = vunpack.c.l.s8.bf16 %v321_v22  ;;  %v768_v25 = vunpack.c.h.s8.bf16 %v320_v13 }
 0x11e   :  { %1368 = vmatprep.subr.bf16.mxu0 %v728_v26  ;;  %1778 = vmatprep.subr.bf16.mxu1 %v730_v27  ;;  %v770_v26 = vunpack.c.h.s8.bf16 %v322_v14  ;;  %v324_v27 = vld [vmem:[#allocation3 + $0x408] sm:$0xff] }
 0x11f   :  { %v776_v39 = vunpack.c.h.s8.bf16 %v324_v27  ;;  %v340_v14 = vld [vmem:[#allocation3 + $0x488] sm:$0xff] }
 0x121   :  { %1369 = vmatpush1.bf16.msra.mxu0 %v727_v30  ;;  %1779 = vmatpush1.bf16.msra.mxu1 %v729_v32  ;;  %v769_v30 = vunpack.c.h.s8.bf16 %v321_v22  ;;  %v772_v32 = vunpack.c.l.s8.bf16 %v324_v27  ;;  %v339_v22 = vld [vmem:[#allocation3 + $0x480] sm:$0xff] }
 0x122   :  { %1370 = vmatprep.subr.bf16.mxu0 %v732_v56  ;;  %1780 = vmatprep.subr.bf16.mxu1 %v734_v33  ;;  %v774_v56 = vunpack.c.l.s8.bf16 %v326_v28  ;;  %v323_v33 = vld [vmem:[#allocation3 + $0x400] sm:$0xff]  ;;  %v344_v28 = vld [vmem:[#allocation3 + $0x4a8] sm:$0xff] }
 0x125   :  { %1371 = vmatpush1.bf16.msra.mxu0 %v731_v36  ;;  %1781 = vmatpush1.bf16.msra.mxu1 %v733_v37  ;;  %v2971_v36 = vld [vmem:[%s3040_s0 + $0x58] sm:$0xff]  ;;  %v2697_v37 = vpack.c.bf16 %v2938_v20, %v2938_v20 }
 0x126   :  { %1372 = vmatprep.subr.bf16.mxu0 %v736_v46  ;;  %1782 = vmatprep.subr.bf16.mxu1 %v738_v38  ;;  %v771_v46 = vunpack.c.l.s8.bf16 %v323_v33  ;;  %v773_v38 = vunpack.c.l.s8.bf16 %v325_v34  ;;  %v343_v34 = vld [vmem:[#allocation3 + $0x4a0] sm:$0xff] }
 0x129   :  { %1373 = vmatpush1.bf16.msra.mxu0 %v735_v41  ;;  %1783 = vmatpush1.bf16.msra.mxu1 %v737_v42  ;;  %v328_v41 = vld [vmem:[#allocation3 + $0x428] sm:$0xff]  ;;  %v330_v42 = vld [vmem:[#allocation3 + $0x438] sm:$0xff] }
 0x12a   :  { %1374 = vmatprep.subr.bf16.mxu0 %v740_v43  ;;  %1784 = vmatprep.subr.bf16.mxu1 %v742_v44  ;;  %v2698_v43 = vpack.c.bf16 %v2957_v62, %v2957_v62  ;;  %v775_v44 = vunpack.c.h.s8.bf16 %v323_v33  ;;  %v780_v20 = vunpack.c.l.s8.bf16 %v328_v41  ;;  %v782_v48 = vunpack.c.l.s8.bf16 %v330_v42 }
 0x12b   :  { %v784_v62 = vunpack.c.h.s8.bf16 %v328_v41  ;;  %v786_v53 = vunpack.c.h.s8.bf16 %v330_v42  ;;  %v348_v41 = vld [vmem:[#allocation3 + $0x4c8] sm:$0xff]  ;;  %v350_v42 = vld [vmem:[#allocation3 + $0x4d8] sm:$0xff] }
 0x12d   :  { %1375 = vmatpush1.bf16.msra.mxu0 %v739_v49  ;;  %1785 = vmatpush1.bf16.msra.mxu1 %v741_v50  ;;  %v327_v49 = vld [vmem:[#allocation3 + $0x420] sm:$0xff]  ;;  %v329_v50 = vld [vmem:[#allocation3 + $0x430] sm:$0xff] }
 0x12e   :  { %1376 = vmatprep.subr.bf16.mxu0 %v744_v51  ;;  %1786 = vmatprep.subr.bf16.mxu1 %v746_v52  ;;  %v779_v51 = vunpack.c.l.s8.bf16 %v327_v49  ;;  %v781_v52 = vunpack.c.l.s8.bf16 %v329_v50 }
 0x131   :  { %1377 = vmatpush1.bf16.msra.mxu0 %v743_v55  ;;  %1787 = vmatpush1.bf16.msra.mxu1 %v745_v58  ;;  %v334_v55 = vld [vmem:[#allocation3 + $0x458] sm:$0xff]  ;;  %v783_v58 = vunpack.c.h.s8.bf16 %v327_v49  ;;  %v349_v49 = vld [vmem:[#allocation3 + $0x4d0] sm:$0xff] }
 0x132   :  { %1378 = vmatprep.subr.bf16.mxu0 %v748_v31  ;;  %1788 = vmatprep.subr.bf16.mxu1 %v750_v59  ;;  %v785_v31 = vunpack.c.h.s8.bf16 %v329_v50  ;;  %v788_v59 = vunpack.c.l.s8.bf16 %v332_v54  ;;  %v790_v60 = vunpack.c.l.s8.bf16 %v334_v55  ;;  %v794_v3 = vunpack.c.h.s8.bf16 %v334_v55 }
 0x135   :  { %1379 = vmatpush1.bf16.msra.mxu0 %v747_v57  ;;  %1789 = vmatpush1.bf16.msra.mxu1 %v749_v0  ;;  %v333_v57 = vld [vmem:[#allocation3 + $0x450] sm:$0xff]  ;;  %v787_v0 = vunpack.c.l.s8.bf16 %v331_v63 }
 0x136   :  { %1380 = vmatprep.subr.bf16.mxu0 %v752_v1  ;;  %1790 = vmatprep.subr.bf16.mxu1 %v754_v2  ;;  %v789_v1 = vunpack.c.l.s8.bf16 %v333_v57  ;;  %v792_v2 = vunpack.c.h.s8.bf16 %v332_v54  ;;  %v354_v54 = vld [vmem:[#allocation3 + $0x4f8] sm:$0xff] }
 0x139   :  { %1381 = vmatpush1.bf16.msra.mxu0 %v751_v5  ;;  %1791 = vmatpush1.bf16.msra.mxu1 %v753_v6  ;;  %v338_v5 = vld [vmem:[#allocation3 + $0x478] sm:$0xff]  ;;  %v791_v6 = vunpack.c.h.s8.bf16 %v331_v63  ;;  %v353_v63 = vld [vmem:[#allocation3 + $0x4f0] sm:$0xff] }
 0x13a   :  { %1382 = vmatprep.subr.bf16.mxu0 %v756_v7  ;;  %1792 = vmatprep.subr.bf16.mxu1 %v758_v45  ;;  %v793_v7 = vunpack.c.h.s8.bf16 %v333_v57  ;;  %v796_v45 = vunpack.c.l.s8.bf16 %v336_v4  ;;  %v798_v8 = vunpack.c.l.s8.bf16 %v338_v5  ;;  %v802_v13 = vunpack.c.h.s8.bf16 %v338_v5 }
 0x13d   :  { %1383 = vmatpush1.bf16.msra.mxu0 %v755_v10  ;;  %1793 = vmatpush1.bf16.msra.mxu1 %v757_v11  ;;  %v337_v10 = vld [vmem:[#allocation3 + $0x470] sm:$0xff]  ;;  %v795_v11 = vunpack.c.l.s8.bf16 %v335_v9 }
 0x13e   :  { %1384 = vmatprep.subr.bf16.mxu0 %v760_v12  ;;  %1794 = vmatprep.subr.bf16.mxu1 %v762_v21  ;;  %v797_v12 = vunpack.c.l.s8.bf16 %v337_v10  ;;  %v800_v21 = vunpack.c.h.s8.bf16 %v336_v4  ;;  %v358_v4 = vld [vmem:[#allocation3 + $0x518] sm:$0xff] }
 0x141   :  { %1385 = vmatpush1.bf16.msra.mxu0 %v759_v15  ;;  %1795 = vmatpush1.bf16.msra.mxu1 %v761_v16  ;;  %v342_v15 = vld [vmem:[#allocation3 + $0x498] sm:$0xff]  ;;  %v799_v16 = vunpack.c.h.s8.bf16 %v335_v9  ;;  %v357_v9 = vld [vmem:[#allocation3 + $0x510] sm:$0xff] }
 0x142   :  { %1386 = vmatprep.subr.bf16.mxu0 %v764_v17  ;;  %1796 = vmatprep.subr.bf16.mxu1 %v766_v18  ;;  %v801_v17 = vunpack.c.h.s8.bf16 %v337_v10  ;;  %v804_v18 = vunpack.c.l.s8.bf16 %v340_v14  ;;  %v806_v19 = vunpack.c.l.s8.bf16 %v342_v15  ;;  %v810_v27 = vunpack.c.h.s8.bf16 %v342_v15  ;;  %v2980_v10 = vld [vmem:[%s3040_s0 + $0x60] sm:$0xff] }
 0x143   :  { %v842_v15 = vunpack.c.h.s8.bf16 %v358_v4 }
 0x145   :  { %1387 = vmatpush1.bf16.msra.mxu0 %v763_v23  ;;  %1797 = vmatpush1.bf16.msra.mxu1 %v765_v24  ;;  %v341_v23 = vld [vmem:[#allocation3 + $0x490] sm:$0xff]  ;;  %v803_v24 = vunpack.c.l.s8.bf16 %v339_v22 }
 0x146   :  { %1388 = vmatprep.subr.bf16.mxu0 %v768_v25  ;;  %1798 = vmatprep.subr.bf16.mxu1 %v770_v26  ;;  %v805_v25 = vunpack.c.l.s8.bf16 %v341_v23  ;;  %v808_v26 = vunpack.c.h.s8.bf16 %v340_v14 }
 0x149   :  { %1389 = vmatpush1.bf16.msra.mxu0 %v767_v29  ;;  %1799 = vmatpush1.bf16.msra.mxu1 %v769_v30  ;;  %v346_v29 = vld [vmem:[#allocation3 + $0x4b8] sm:$0xff]  ;;  %v807_v30 = vunpack.c.h.s8.bf16 %v339_v22  ;;  %v841_v22 = vunpack.c.h.s8.bf16 %v357_v9 }
 0x14a   :  { %1399 = vmatprep.subr.bf16.mxu0 %v772_v32  ;;  %1809 = vmatprep.subr.bf16.mxu1 %v774_v56  ;;  %v809_v32 = vunpack.c.h.s8.bf16 %v341_v23  ;;  %v812_v56 = vunpack.c.l.s8.bf16 %v344_v28  ;;  %v814_v33 = vunpack.c.l.s8.bf16 %v346_v29 }
 0x14c   :  { %1391 = vmatmul.mubr.bf16.vlgmr.msra.gmra.mrb[0].mxu0 %v2697_v37  ;;  %1801 = vmatmul.mubr.bf16.vlgmr.msra.gmra.mrb[0].mxu1 %v2697_v37  ;;  %v345_v37 = vld [vmem:[#allocation3 + $0x4b0] sm:$0xff] }
 0x14d   :  { %1400 = vmatpush1.bf16.msra.mxu0 %v771_v46  ;;  %1810 = vmatpush1.bf16.msra.mxu1 %v773_v38  ;;  %v811_v46 = vunpack.c.l.s8.bf16 %v343_v34  ;;  %v813_v38 = vunpack.c.l.s8.bf16 %v345_v37 }
 0x14e   :  { %1401 = vmatprep.subr.bf16.mxu0 %v776_v39  ;;  %1811 = vmatprep.subr.bf16.mxu1 %v778_v40  ;;  %v816_v39 = vunpack.c.h.s8.bf16 %v344_v28  ;;  %v818_v40 = vunpack.c.h.s8.bf16 %v346_v29  ;;  %v364_v29 = vld [vmem:[#allocation3 + $0x548] sm:$0xff] }
 0x14f   :  { %1431 = vmatprep.mubr.bf16.mxu0 %v2698_v43  ;;  %1841 = vmatprep.mubr.bf16.mxu1 %v2698_v43  ;;  %v815_v43 = vunpack.c.h.s8.bf16 %v343_v34 }
 0x151   :  { %1402 = vmatpush1.bf16.msra.mxu0 %v775_v44  ;;  %1812 = vmatpush1.bf16.msra.mxu1 %v777_v47  ;;  %v817_v44 = vunpack.c.h.s8.bf16 %v345_v37  ;;  %v820_v47 = vunpack.c.l.s8.bf16 %v348_v41  ;;  %v363_v37 = vld [vmem:[#allocation3 + $0x540] sm:$0xff] }
 0x152   :  { %1403 = vmatprep.subr.bf16.mxu0 %v780_v20  ;;  %1813 = vmatprep.subr.bf16.mxu1 %v782_v48  ;;  %v822_v20 = vunpack.c.l.s8.bf16 %v350_v42  ;;  %v347_v48 = vld [vmem:[#allocation3 + $0x4c0] sm:$0xff] }
 0x153   :  { %v819_v50 = vunpack.c.l.s8.bf16 %v347_v48  ;;  %v823_v55 = vunpack.c.h.s8.bf16 %v347_v48 }
 0x155   :  { %1404 = vmatpush1.bf16.msra.mxu0 %v779_v51  ;;  %1814 = vmatpush1.bf16.msra.mxu1 %v781_v52  ;;  %v821_v51 = vunpack.c.l.s8.bf16 %v349_v49  ;;  %v824_v52 = vunpack.c.h.s8.bf16 %v348_v41 }
 0x156   :  { %1405 = vmatprep.subr.bf16.mxu0 %v784_v62  ;;  %1815 = vmatprep.subr.bf16.mxu1 %v786_v53  ;;  %v826_v62 = vunpack.c.h.s8.bf16 %v350_v42  ;;  %v352_v53 = vld [vmem:[#allocation3 + $0x4e8] sm:$0xff] }
 0x157   :  { %v368_v42 = vld [vmem:[#allocation3 + $0x568] sm:$0xff] }
 0x159   :  { %1406 = vmatpush1.bf16.msra.mxu0 %v783_v58  ;;  %1816 = vmatpush1.bf16.msra.mxu1 %v785_v31  ;;  %v825_v58 = vunpack.c.h.s8.bf16 %v349_v49  ;;  %v828_v31 = vunpack.c.l.s8.bf16 %v352_v53  ;;  %v367_v49 = vld [vmem:[#allocation3 + $0x560] sm:$0xff] }
 0x15a   :  { %1407 = vmatprep.subr.bf16.mxu0 %v788_v59  ;;  %1817 = vmatprep.subr.bf16.mxu1 %v790_v60  ;;  %v830_v59 = vunpack.c.l.s8.bf16 %v354_v54  ;;  %v351_v60 = vld [vmem:[#allocation3 + $0x4e0] sm:$0xff] }
 0x15b   :  { %v827_v57 = vunpack.c.l.s8.bf16 %v351_v60  ;;  %v831_v5 = vunpack.c.h.s8.bf16 %v351_v60 }
 0x15d   :  { %1408 = vmatpush1.bf16.msra.mxu0 %v787_v0  ;;  %1818 = vmatpush1.bf16.msra.mxu1 %v789_v1  ;;  %v829_v0 = vunpack.c.l.s8.bf16 %v353_v63  ;;  %v832_v1 = vunpack.c.h.s8.bf16 %v352_v53 }
 0x15e   :  { %1409 = vmatprep.subr.bf16.mxu0 %v792_v2  ;;  %1819 = vmatprep.subr.bf16.mxu1 %v794_v3  ;;  %v834_v2 = vunpack.c.h.s8.bf16 %v354_v54  ;;  %v356_v3 = vld [vmem:[#allocation3 + $0x508] sm:$0xff] }
 0x15f   :  { %v840_v14 = vunpack.c.h.s8.bf16 %v356_v3  ;;  %v372_v54 = vld [vmem:[#allocation3 + $0x588] sm:$0xff] }
 0x161   :  { %1410 = vmatpush1.bf16.msra.mxu0 %v791_v6  ;;  %1820 = vmatpush1.bf16.msra.mxu1 %v793_v7  ;;  %v833_v6 = vunpack.c.h.s8.bf16 %v353_v63  ;;  %v836_v7 = vunpack.c.l.s8.bf16 %v356_v3  ;;  %v371_v63 = vld [vmem:[#allocation3 + $0x580] sm:$0xff] }
 0x162   :  { %1411 = vmatprep.subr.bf16.mxu0 %v796_v45  ;;  %1821 = vmatprep.subr.bf16.mxu1 %v798_v8  ;;  %v838_v45 = vunpack.c.l.s8.bf16 %v358_v4  ;;  %v355_v8 = vld [vmem:[#allocation3 + $0x500] sm:$0xff]  ;;  %v376_v4 = vld [vmem:[#allocation3 + $0x5a8] sm:$0xff] }
 0x165   :  { %1412 = vmatpush1.bf16.msra.mxu0 %v795_v11  ;;  %1822 = vmatpush1.bf16.msra.mxu1 %v797_v12  ;;  %v2985_v11 = vld [vmem:[%s3040_s0 + $0x68] sm:$0xff]  ;;  %v2699_v12 = vpack.c.bf16 %v2952_v61, %v2952_v61 }
 0x166   :  { %1413 = vmatprep.subr.bf16.mxu0 %v800_v21  ;;  %1823 = vmatprep.subr.bf16.mxu1 %v802_v13  ;;  %v835_v21 = vunpack.c.l.s8.bf16 %v355_v8  ;;  %v837_v13 = vunpack.c.l.s8.bf16 %v357_v9  ;;  %v375_v9 = vld [vmem:[#allocation3 + $0x5a0] sm:$0xff] }
 0x169   :  { %1414 = vmatpush1.bf16.msra.mxu0 %v799_v16  ;;  %1824 = vmatpush1.bf16.msra.mxu1 %v801_v17  ;;  %v360_v16 = vld [vmem:[#allocation3 + $0x528] sm:$0xff]  ;;  %v362_v17 = vld [vmem:[#allocation3 + $0x538] sm:$0xff] }
 0x16a   :  { %1415 = vmatprep.subr.bf16.mxu0 %v804_v18  ;;  %1825 = vmatprep.subr.bf16.mxu1 %v806_v19  ;;  %v2700_v18 = vpack.c.bf16 %v2971_v36, %v2971_v36  ;;  %v839_v19 = vunpack.c.h.s8.bf16 %v355_v8  ;;  %v844_v61 = vunpack.c.l.s8.bf16 %v360_v16  ;;  %v846_v23 = vunpack.c.l.s8.bf16 %v362_v17 }
 0x16b   :  { %v848_v36 = vunpack.c.h.s8.bf16 %v360_v16  ;;  %v850_v28 = vunpack.c.h.s8.bf16 %v362_v17  ;;  %v380_v16 = vld [vmem:[#allocation3 + $0x5c8] sm:$0xff]  ;;  %v382_v17 = vld [vmem:[#allocation3 + $0x5d8] sm:$0xff] }
 0x16d   :  { %1416 = vmatpush1.bf16.msra.mxu0 %v803_v24  ;;  %1826 = vmatpush1.bf16.msra.mxu1 %v805_v25  ;;  %v359_v24 = vld [vmem:[#allocation3 + $0x520] sm:$0xff]  ;;  %v361_v25 = vld [vmem:[#allocation3 + $0x530] sm:$0xff] }
 0x16e   :  { %1417 = vmatprep.subr.bf16.mxu0 %v808_v26  ;;  %1827 = vmatprep.subr.bf16.mxu1 %v810_v27  ;;  %v843_v26 = vunpack.c.l.s8.bf16 %v359_v24  ;;  %v845_v27 = vunpack.c.l.s8.bf16 %v361_v25 }
 0x171   :  { %1418 = vmatpush1.bf16.msra.mxu0 %v807_v30  ;;  %1828 = vmatpush1.bf16.msra.mxu1 %v809_v32  ;;  %v366_v30 = vld [vmem:[#allocation3 + $0x558] sm:$0xff]  ;;  %v847_v32 = vunpack.c.h.s8.bf16 %v359_v24  ;;  %v381_v24 = vld [vmem:[#allocation3 + $0x5d0] sm:$0xff] }
 0x172   :  { %1419 = vmatprep.subr.bf16.mxu0 %v812_v56  ;;  %1829 = vmatprep.subr.bf16.mxu1 %v814_v33  ;;  %v849_v56 = vunpack.c.h.s8.bf16 %v361_v25  ;;  %v852_v33 = vunpack.c.l.s8.bf16 %v364_v29  ;;  %v854_v34 = vunpack.c.l.s8.bf16 %v366_v30  ;;  %v858_v41 = vunpack.c.h.s8.bf16 %v366_v30 }
 0x175   :  { %1420 = vmatpush1.bf16.msra.mxu0 %v811_v46  ;;  %1830 = vmatpush1.bf16.msra.mxu1 %v813_v38  ;;  %v365_v46 = vld [vmem:[#allocation3 + $0x550] sm:$0xff]  ;;  %v851_v38 = vunpack.c.l.s8.bf16 %v363_v37 }
 0x176   :  { %1421 = vmatprep.subr.bf16.mxu0 %v816_v39  ;;  %1831 = vmatprep.subr.bf16.mxu1 %v818_v40  ;;  %v853_v39 = vunpack.c.l.s8.bf16 %v365_v46  ;;  %v856_v40 = vunpack.c.h.s8.bf16 %v364_v29  ;;  %v386_v29 = vld [vmem:[#allocation3 + $0x5f8] sm:$0xff] }
 0x179   :  { %1422 = vmatpush1.bf16.msra.mxu0 %v815_v43  ;;  %1832 = vmatpush1.bf16.msra.mxu1 %v817_v44  ;;  %v370_v43 = vld [vmem:[#allocation3 + $0x578] sm:$0xff]  ;;  %v855_v44 = vunpack.c.h.s8.bf16 %v363_v37  ;;  %v385_v37 = vld [vmem:[#allocation3 + $0x5f0] sm:$0xff] }
 0x17a   :  { %1423 = vmatprep.subr.bf16.mxu0 %v820_v47  ;;  %1833 = vmatprep.subr.bf16.mxu1 %v822_v20  ;;  %v857_v47 = vunpack.c.h.s8.bf16 %v365_v46  ;;  %v860_v20 = vunpack.c.l.s8.bf16 %v368_v42  ;;  %v862_v48 = vunpack.c.l.s8.bf16 %v370_v43  ;;  %v866_v53 = vunpack.c.h.s8.bf16 %v370_v43 }
 0x17d   :  { %1424 = vmatpush1.bf16.msra.mxu0 %v819_v50  ;;  %1834 = vmatpush1.bf16.msra.mxu1 %v821_v51  ;;  %v369_v50 = vld [vmem:[#allocation3 + $0x570] sm:$0xff]  ;;  %v859_v51 = vunpack.c.l.s8.bf16 %v367_v49 }
 0x17e   :  { %1425 = vmatprep.subr.bf16.mxu0 %v824_v52  ;;  %1835 = vmatprep.subr.bf16.mxu1 %v826_v62  ;;  %v861_v52 = vunpack.c.l.s8.bf16 %v369_v50  ;;  %v864_v62 = vunpack.c.h.s8.bf16 %v368_v42  ;;  %v390_v42 = vld [vmem:[#allocation3 + $0x618] sm:$0xff] }
 0x181   :  { %1426 = vmatpush1.bf16.msra.mxu0 %v823_v55  ;;  %1836 = vmatpush1.bf16.msra.mxu1 %v825_v58  ;;  %v374_v55 = vld [vmem:[#allocation3 + $0x598] sm:$0xff]  ;;  %v863_v58 = vunpack.c.h.s8.bf16 %v367_v49  ;;  %v389_v49 = vld [vmem:[#allocation3 + $0x610] sm:$0xff] }
 0x182   :  { %1427 = vmatprep.subr.bf16.mxu0 %v828_v31  ;;  %1837 = vmatprep.subr.bf16.mxu1 %v830_v59  ;;  %v865_v31 = vunpack.c.h.s8.bf16 %v369_v50  ;;  %v868_v59 = vunpack.c.l.s8.bf16 %v372_v54  ;;  %v870_v60 = vunpack.c.l.s8.bf16 %v374_v55  ;;  %v874_v3 = vunpack.c.h.s8.bf16 %v374_v55  ;;  %v2994_v50 = vld [vmem:[%s3040_s0 + $0x70] sm:$0xff] }
 0x183   :  { %v906_v55 = vunpack.c.h.s8.bf16 %v390_v42 }
 0x185   :  { %1428 = vmatpush1.bf16.msra.mxu0 %v827_v57  ;;  %1838 = vmatpush1.bf16.msra.mxu1 %v829_v0  ;;  %v373_v57 = vld [vmem:[#allocation3 + $0x590] sm:$0xff]  ;;  %v867_v0 = vunpack.c.l.s8.bf16 %v371_v63 }
 0x186   :  { %1429 = vmatprep.subr.bf16.mxu0 %v832_v1  ;;  %1839 = vmatprep.subr.bf16.mxu1 %v834_v2  ;;  %v869_v1 = vunpack.c.l.s8.bf16 %v373_v57  ;;  %v872_v2 = vunpack.c.h.s8.bf16 %v372_v54 }
 0x189   :  { %1430 = vmatpush1.bf16.msra.mxu0 %v831_v5  ;;  %1840 = vmatpush1.bf16.msra.mxu1 %v833_v6  ;;  %v378_v5 = vld [vmem:[#allocation3 + $0x5b8] sm:$0xff]  ;;  %v871_v6 = vunpack.c.h.s8.bf16 %v371_v63  ;;  %v905_v63 = vunpack.c.h.s8.bf16 %v389_v49 }
 0x18a   :  { %1440 = vmatprep.subr.bf16.mxu0 %v836_v7  ;;  %1850 = vmatprep.subr.bf16.mxu1 %v838_v45  ;;  %v873_v7 = vunpack.c.h.s8.bf16 %v373_v57  ;;  %v876_v45 = vunpack.c.l.s8.bf16 %v376_v4  ;;  %v878_v8 = vunpack.c.l.s8.bf16 %v378_v5 }
 0x18c   :  { %1432 = vmatmul.mubr.bf16.vlgmr.msra.gmra.mrb[0].mxu0 %v2699_v12  ;;  %1842 = vmatmul.mubr.bf16.vlgmr.msra.gmra.mrb[0].mxu1 %v2699_v12  ;;  %v377_v12 = vld [vmem:[#allocation3 + $0x5b0] sm:$0xff] }
 0x18d   :  { %1441 = vmatpush1.bf16.msra.mxu0 %v835_v21  ;;  %1851 = vmatpush1.bf16.msra.mxu1 %v837_v13  ;;  %v875_v21 = vunpack.c.l.s8.bf16 %v375_v9  ;;  %v877_v13 = vunpack.c.l.s8.bf16 %v377_v12 }
 0x18e   :  { %1442 = vmatprep.subr.bf16.mxu0 %v840_v14  ;;  %1852 = vmatprep.subr.bf16.mxu1 %v842_v15  ;;  %v880_v14 = vunpack.c.h.s8.bf16 %v376_v4  ;;  %v882_v15 = vunpack.c.h.s8.bf16 %v378_v5  ;;  %v396_v5 = vld [vmem:[#allocation3 + $0x648] sm:$0xff] }
 0x18f   :  { %1472 = vmatprep.mubr.bf16.mxu0 %v2700_v18  ;;  %1882 = vmatprep.mubr.bf16.mxu1 %v2700_v18  ;;  %v879_v18 = vunpack.c.h.s8.bf16 %v375_v9 }
 0x191   :  { %1443 = vmatpush1.bf16.msra.mxu0 %v839_v19  ;;  %1853 = vmatpush1.bf16.msra.mxu1 %v841_v22  ;;  %v881_v19 = vunpack.c.h.s8.bf16 %v377_v12  ;;  %v884_v22 = vunpack.c.l.s8.bf16 %v380_v16  ;;  %v395_v12 = vld [vmem:[#allocation3 + $0x640] sm:$0xff] }
 0x192   :  { %1444 = vmatprep.subr.bf16.mxu0 %v844_v61  ;;  %1854 = vmatprep.subr.bf16.mxu1 %v846_v23  ;;  %v886_v61 = vunpack.c.l.s8.bf16 %v382_v17  ;;  %v379_v23 = vld [vmem:[#allocation3 + $0x5c0] sm:$0xff] }
 0x193   :  { %v883_v25 = vunpack.c.l.s8.bf16 %v379_v23  ;;  %v887_v30 = vunpack.c.h.s8.bf16 %v379_v23 }
 0x195   :  { %1445 = vmatpush1.bf16.msra.mxu0 %v843_v26  ;;  %1855 = vmatpush1.bf16.msra.mxu1 %v845_v27  ;;  %v885_v26 = vunpack.c.l.s8.bf16 %v381_v24  ;;  %v888_v27 = vunpack.c.h.s8.bf16 %v380_v16 }
 0x196   :  { %1446 = vmatprep.subr.bf16.mxu0 %v848_v36  ;;  %1856 = vmatprep.subr.bf16.mxu1 %v850_v28  ;;  %v890_v36 = vunpack.c.h.s8.bf16 %v382_v17  ;;  %v384_v28 = vld [vmem:[#allocation3 + $0x5e8] sm:$0xff] }
 0x197   :  { %v400_v17 = vld [vmem:[#allocation3 + $0x668] sm:$0xff] }
 0x199   :  { %1447 = vmatpush1.bf16.msra.mxu0 %v847_v32  ;;  %1857 = vmatpush1.bf16.msra.mxu1 %v849_v56  ;;  %v889_v32 = vunpack.c.h.s8.bf16 %v381_v24  ;;  %v892_v56 = vunpack.c.l.s8.bf16 %v384_v28  ;;  %v399_v24 = vld [vmem:[#allocation3 + $0x660] sm:$0xff] }
 0x19a   :  { %1448 = vmatprep.subr.bf16.mxu0 %v852_v33  ;;  %1858 = vmatprep.subr.bf16.mxu1 %v854_v34  ;;  %v894_v33 = vunpack.c.l.s8.bf16 %v386_v29  ;;  %v383_v34 = vld [vmem:[#allocation3 + $0x5e0] sm:$0xff] }
 0x19b   :  { %v891_v46 = vunpack.c.l.s8.bf16 %v383_v34  ;;  %v895_v43 = vunpack.c.h.s8.bf16 %v383_v34 }
 0x19d   :  { %1449 = vmatpush1.bf16.msra.mxu0 %v851_v38  ;;  %1859 = vmatpush1.bf16.msra.mxu1 %v853_v39  ;;  %v893_v38 = vunpack.c.l.s8.bf16 %v385_v37  ;;  %v896_v39 = vunpack.c.h.s8.bf16 %v384_v28 }
 0x19e   :  { %1450 = vmatprep.subr.bf16.mxu0 %v856_v40  ;;  %1860 = vmatprep.subr.bf16.mxu1 %v858_v41  ;;  %v898_v40 = vunpack.c.h.s8.bf16 %v386_v29  ;;  %v388_v41 = vld [vmem:[#allocation3 + $0x608] sm:$0xff] }
 0x19f   :  { %v904_v54 = vunpack.c.h.s8.bf16 %v388_v41  ;;  %v404_v29 = vld [vmem:[#allocation3 + $0x688] sm:$0xff] }
 0x1a1   :  { %1451 = vmatpush1.bf16.msra.mxu0 %v855_v44  ;;  %1861 = vmatpush1.bf16.msra.mxu1 %v857_v47  ;;  %v897_v44 = vunpack.c.h.s8.bf16 %v385_v37  ;;  %v900_v47 = vunpack.c.l.s8.bf16 %v388_v41  ;;  %v403_v37 = vld [vmem:[#allocation3 + $0x680] sm:$0xff] }
 0x1a2   :  { %1452 = vmatprep.subr.bf16.mxu0 %v860_v20  ;;  %1862 = vmatprep.subr.bf16.mxu1 %v862_v48  ;;  %v902_v20 = vunpack.c.l.s8.bf16 %v390_v42  ;;  %v387_v48 = vld [vmem:[#allocation3 + $0x600] sm:$0xff]  ;;  %v408_v42 = vld [vmem:[#allocation3 + $0x6a8] sm:$0xff] }
 0x1a5   :  { %1453 = vmatpush1.bf16.msra.mxu0 %v859_v51  ;;  %1863 = vmatpush1.bf16.msra.mxu1 %v861_v52  ;;  %v2999_v51 = vld [vmem:[%s3040_s0 + $0x78] sm:$0xff]  ;;  %v2701_v52 = vpack.c.bf16 %v2966_v35, %v2966_v35 }
 0x1a6   :  { %1454 = vmatprep.subr.bf16.mxu0 %v864_v62  ;;  %1864 = vmatprep.subr.bf16.mxu1 %v866_v53  ;;  %v899_v62 = vunpack.c.l.s8.bf16 %v387_v48  ;;  %v901_v53 = vunpack.c.l.s8.bf16 %v389_v49  ;;  %v407_v49 = vld [vmem:[#allocation3 + $0x6a0] sm:$0xff] }
 0x1a9   :  { %1455 = vmatpush1.bf16.msra.mxu0 %v863_v58  ;;  %1865 = vmatpush1.bf16.msra.mxu1 %v865_v31  ;;  %v392_v58 = vld [vmem:[#allocation3 + $0x628] sm:$0xff]  ;;  %v394_v31 = vld [vmem:[#allocation3 + $0x638] sm:$0xff] }
 0x1aa   :  { %1456 = vmatprep.subr.bf16.mxu0 %v868_v59  ;;  %1866 = vmatprep.subr.bf16.mxu1 %v870_v60  ;;  %v2702_v59 = vpack.c.bf16 %v2985_v11, %v2985_v11  ;;  %v903_v60 = vunpack.c.h.s8.bf16 %v387_v48  ;;  %v908_v35 = vunpack.c.l.s8.bf16 %v392_v58  ;;  %v910_v57 = vunpack.c.l.s8.bf16 %v394_v31 }
 0x1ab   :  { %v912_v11 = vunpack.c.h.s8.bf16 %v392_v58  ;;  %v914_v4 = vunpack.c.h.s8.bf16 %v394_v31  ;;  %v412_v58 = vld [vmem:[#allocation3 + $0x6c8] sm:$0xff]  ;;  %v414_v31 = vld [vmem:[#allocation3 + $0x6d8] sm:$0xff] }
 0x1ad   :  { %1457 = vmatpush1.bf16.msra.mxu0 %v867_v0  ;;  %1867 = vmatpush1.bf16.msra.mxu1 %v869_v1  ;;  %v391_v0 = vld [vmem:[#allocation3 + $0x620] sm:$0xff]  ;;  %v393_v1 = vld [vmem:[#allocation3 + $0x630] sm:$0xff] }
 0x1ae   :  { %1458 = vmatprep.subr.bf16.mxu0 %v872_v2  ;;  %1868 = vmatprep.subr.bf16.mxu1 %v874_v3  ;;  %v907_v2 = vunpack.c.l.s8.bf16 %v391_v0  ;;  %v909_v3 = vunpack.c.l.s8.bf16 %v393_v1 }
 0x1b1   :  { %1459 = vmatpush1.bf16.msra.mxu0 %v871_v6  ;;  %1869 = vmatpush1.bf16.msra.mxu1 %v873_v7  ;;  %v398_v6 = vld [vmem:[#allocation3 + $0x658] sm:$0xff]  ;;  %v911_v7 = vunpack.c.h.s8.bf16 %v391_v0  ;;  %v413_v0 = vld [vmem:[#allocation3 + $0x6d0] sm:$0xff] }
 0x1b2   :  { %1460 = vmatprep.subr.bf16.mxu0 %v876_v45  ;;  %1870 = vmatprep.subr.bf16.mxu1 %v878_v8  ;;  %v913_v45 = vunpack.c.h.s8.bf16 %v393_v1  ;;  %v916_v8 = vunpack.c.l.s8.bf16 %v396_v5  ;;  %v918_v9 = vunpack.c.l.s8.bf16 %v398_v6  ;;  %v922_v16 = vunpack.c.h.s8.bf16 %v398_v6 }
 0x1b5   :  { %1461 = vmatpush1.bf16.msra.mxu0 %v875_v21  ;;  %1871 = vmatpush1.bf16.msra.mxu1 %v877_v13  ;;  %v397_v21 = vld [vmem:[#allocation3 + $0x650] sm:$0xff]  ;;  %v915_v13 = vunpack.c.l.s8.bf16 %v395_v12 }
 0x1b6   :  { %1462 = vmatprep.subr.bf16.mxu0 %v880_v14  ;;  %1872 = vmatprep.subr.bf16.mxu1 %v882_v15  ;;  %v917_v14 = vunpack.c.l.s8.bf16 %v397_v21  ;;  %v920_v15 = vunpack.c.h.s8.bf16 %v396_v5  ;;  %v418_v5 = vld [vmem:[#allocation3 + $0x6f8] sm:$0xff] }
 0x1b9   :  { %1463 = vmatpush1.bf16.msra.mxu0 %v879_v18  ;;  %1873 = vmatpush1.bf16.msra.mxu1 %v881_v19  ;;  %v402_v18 = vld [vmem:[#allocation3 + $0x678] sm:$0xff]  ;;  %v919_v19 = vunpack.c.h.s8.bf16 %v395_v12  ;;  %v417_v12 = vld [vmem:[#allocation3 + $0x6f0] sm:$0xff] }
 0x1ba   :  { %1464 = vmatprep.subr.bf16.mxu0 %v884_v22  ;;  %1874 = vmatprep.subr.bf16.mxu1 %v886_v61  ;;  %v921_v22 = vunpack.c.h.s8.bf16 %v397_v21  ;;  %v924_v61 = vunpack.c.l.s8.bf16 %v400_v17  ;;  %v926_v23 = vunpack.c.l.s8.bf16 %v402_v18  ;;  %v930_v28 = vunpack.c.h.s8.bf16 %v402_v18 }
 0x1bd   :  { %1465 = vmatpush1.bf16.msra.mxu0 %v883_v25  ;;  %1875 = vmatpush1.bf16.msra.mxu1 %v885_v26  ;;  %v401_v25 = vld [vmem:[#allocation3 + $0x670] sm:$0xff]  ;;  %v923_v26 = vunpack.c.l.s8.bf16 %v399_v24 }
 0x1be   :  { %1466 = vmatprep.subr.bf16.mxu0 %v888_v27  ;;  %1876 = vmatprep.subr.bf16.mxu1 %v890_v36  ;;  %v925_v27 = vunpack.c.l.s8.bf16 %v401_v25  ;;  %v928_v36 = vunpack.c.h.s8.bf16 %v400_v17  ;;  %v422_v17 = vld [vmem:[#allocation3 + $0x718] sm:$0xff] }
 0x1c1   :  { %1467 = vmatpush1.bf16.msra.mxu0 %v887_v30  ;;  %1877 = vmatpush1.bf16.msra.mxu1 %v889_v32  ;;  %v406_v30 = vld [vmem:[#allocation3 + $0x698] sm:$0xff]  ;;  %v927_v32 = vunpack.c.h.s8.bf16 %v399_v24  ;;  %v421_v24 = vld [vmem:[#allocation3 + $0x710] sm:$0xff] }
 0x1c2   :  { %1468 = vmatprep.subr.bf16.mxu0 %v892_v56  ;;  %1878 = vmatprep.subr.bf16.mxu1 %v894_v33  ;;  %v929_v56 = vunpack.c.h.s8.bf16 %v401_v25  ;;  %v932_v33 = vunpack.c.l.s8.bf16 %v404_v29  ;;  %v934_v34 = vunpack.c.l.s8.bf16 %v406_v30  ;;  %v938_v41 = vunpack.c.h.s8.bf16 %v406_v30  ;;  %v3008_v25 = vld [vmem:[%s3040_s0 + $0x80] sm:$0xff] }
 0x1c3   :  { %v970_v30 = vunpack.c.h.s8.bf16 %v422_v17 }
 0x1c5   :  { %1469 = vmatpush1.bf16.msra.mxu0 %v891_v46  ;;  %1879 = vmatpush1.bf16.msra.mxu1 %v893_v38  ;;  %v405_v46 = vld [vmem:[#allocation3 + $0x690] sm:$0xff]  ;;  %v931_v38 = vunpack.c.l.s8.bf16 %v403_v37 }
 0x1c6   :  { %1470 = vmatprep.subr.bf16.mxu0 %v896_v39  ;;  %1880 = vmatprep.subr.bf16.mxu1 %v898_v40  ;;  %v933_v39 = vunpack.c.l.s8.bf16 %v405_v46  ;;  %v936_v40 = vunpack.c.h.s8.bf16 %v404_v29 }
 0x1c9   :  { %1471 = vmatpush1.bf16.msra.mxu0 %v895_v43  ;;  %1881 = vmatpush1.bf16.msra.mxu1 %v897_v44  ;;  %v410_v43 = vld [vmem:[#allocation3 + $0x6b8] sm:$0xff]  ;;  %v935_v44 = vunpack.c.h.s8.bf16 %v403_v37  ;;  %v969_v37 = vunpack.c.h.s8.bf16 %v421_v24 }
 0x1ca   :  { %1481 = vmatprep.subr.bf16.mxu0 %v900_v47  ;;  %1891 = vmatprep.subr.bf16.mxu1 %v902_v20  ;;  %v937_v47 = vunpack.c.h.s8.bf16 %v405_v46  ;;  %v940_v20 = vunpack.c.l.s8.bf16 %v408_v42  ;;  %v942_v48 = vunpack.c.l.s8.bf16 %v410_v43 }
 0x1cc   :  { %1473 = vmatmul.mubr.bf16.vlgmr.msra.gmra.mrb[0].mxu0 %v2701_v52  ;;  %1883 = vmatmul.mubr.bf16.vlgmr.msra.gmra.mrb[0].mxu1 %v2701_v52  ;;  %v409_v52 = vld [vmem:[#allocation3 + $0x6b0] sm:$0xff] }
 0x1cd   :  { %1482 = vmatpush1.bf16.msra.mxu0 %v899_v62  ;;  %1892 = vmatpush1.bf16.msra.mxu1 %v901_v53  ;;  %v939_v62 = vunpack.c.l.s8.bf16 %v407_v49  ;;  %v941_v53 = vunpack.c.l.s8.bf16 %v409_v52 }
 0x1ce   :  { %1483 = vmatprep.subr.bf16.mxu0 %v904_v54  ;;  %1893 = vmatprep.subr.bf16.mxu1 %v906_v55  ;;  %v944_v54 = vunpack.c.h.s8.bf16 %v408_v42  ;;  %v946_v55 = vunpack.c.h.s8.bf16 %v410_v43  ;;  %v428_v43 = vld [vmem:[#allocation3 + $0x748] sm:$0xff] }
 0x1cf   :  { %1513 = vmatprep.mubr.bf16.mxu0 %v2702_v59  ;;  %1923 = vmatprep.mubr.bf16.mxu1 %v2702_v59  ;;  %v943_v59 = vunpack.c.h.s8.bf16 %v407_v49 }
 0x1d1   :  { %1484 = vmatpush1.bf16.msra.mxu0 %v903_v60  ;;  %1894 = vmatpush1.bf16.msra.mxu1 %v905_v63  ;;  %v945_v60 = vunpack.c.h.s8.bf16 %v409_v52  ;;  %v948_v63 = vunpack.c.l.s8.bf16 %v412_v58  ;;  %v427_v52 = vld [vmem:[#allocation3 + $0x740] sm:$0xff] }
 0x1d2   :  { %1485 = vmatprep.subr.bf16.mxu0 %v908_v35  ;;  %1895 = vmatprep.subr.bf16.mxu1 %v910_v57  ;;  %v950_v35 = vunpack.c.l.s8.bf16 %v414_v31  ;;  %v411_v57 = vld [vmem:[#allocation3 + $0x6c0] sm:$0xff] }
 0x1d3   :  { %v947_v1 = vunpack.c.l.s8.bf16 %v411_v57  ;;  %v951_v6 = vunpack.c.h.s8.bf16 %v411_v57 }
 0x1d5   :  { %1486 = vmatpush1.bf16.msra.mxu0 %v907_v2  ;;  %1896 = vmatpush1.bf16.msra.mxu1 %v909_v3  ;;  %v949_v2 = vunpack.c.l.s8.bf16 %v413_v0  ;;  %v952_v3 = vunpack.c.h.s8.bf16 %v412_v58 }
 0x1d6   :  { %1487 = vmatprep.subr.bf16.mxu0 %v912_v11  ;;  %1897 = vmatprep.subr.bf16.mxu1 %v914_v4  ;;  %v954_v11 = vunpack.c.h.s8.bf16 %v414_v31  ;;  %v416_v4 = vld [vmem:[#allocation3 + $0x6e8] sm:$0xff] }
 0x1d7   :  { %v432_v31 = vld [vmem:[#allocation3 + $0x768] sm:$0xff] }
 0x1d9   :  { %1488 = vmatpush1.bf16.msra.mxu0 %v911_v7  ;;  %1898 = vmatpush1.bf16.msra.mxu1 %v913_v45  ;;  %v953_v7 = vunpack.c.h.s8.bf16 %v413_v0  ;;  %v956_v45 = vunpack.c.l.s8.bf16 %v416_v4  ;;  %v431_v0 = vld [vmem:[#allocation3 + $0x760] sm:$0xff] }
 0x1da   :  { %1489 = vmatprep.subr.bf16.mxu0 %v916_v8  ;;  %1899 = vmatprep.subr.bf16.mxu1 %v918_v9  ;;  %v958_v8 = vunpack.c.l.s8.bf16 %v418_v5  ;;  %v415_v9 = vld [vmem:[#allocation3 + $0x6e0] sm:$0xff] }
 0x1db   :  { %v955_v21 = vunpack.c.l.s8.bf16 %v415_v9  ;;  %v959_v18 = vunpack.c.h.s8.bf16 %v415_v9 }
 0x1dd   :  { %1490 = vmatpush1.bf16.msra.mxu0 %v915_v13  ;;  %1900 = vmatpush1.bf16.msra.mxu1 %v917_v14  ;;  %v957_v13 = vunpack.c.l.s8.bf16 %v417_v12  ;;  %v960_v14 = vunpack.c.h.s8.bf16 %v416_v4 }
 0x1de   :  { %1491 = vmatprep.subr.bf16.mxu0 %v920_v15  ;;  %1901 = vmatprep.subr.bf16.mxu1 %v922_v16  ;;  %v962_v15 = vunpack.c.h.s8.bf16 %v418_v5  ;;  %v420_v16 = vld [vmem:[#allocation3 + $0x708] sm:$0xff] }
 0x1df   :  { %v968_v29 = vunpack.c.h.s8.bf16 %v420_v16  ;;  %v436_v5 = vld [vmem:[#allocation3 + $0x788] sm:$0xff] }
 0x1e1   :  { %1492 = vmatpush1.bf16.msra.mxu0 %v919_v19  ;;  %1902 = vmatpush1.bf16.msra.mxu1 %v921_v22  ;;  %v961_v19 = vunpack.c.h.s8.bf16 %v417_v12  ;;  %v964_v22 = vunpack.c.l.s8.bf16 %v420_v16  ;;  %v435_v12 = vld [vmem:[#allocation3 + $0x780] sm:$0xff] }
 0x1e2   :  { %1493 = vmatprep.subr.bf16.mxu0 %v924_v61  ;;  %1903 = vmatprep.subr.bf16.mxu1 %v926_v23  ;;  %v966_v61 = vunpack.c.l.s8.bf16 %v422_v17  ;;  %v419_v23 = vld [vmem:[#allocation3 + $0x700] sm:$0xff]  ;;  %v440_v17 = vld [vmem:[#allocation3 + $0x7a8] sm:$0xff] }
 0x1e5   :  { %1494 = vmatpush1.bf16.msra.mxu0 %v923_v26  ;;  %1904 = vmatpush1.bf16.msra.mxu1 %v925_v27  ;;  %v3013_v26 = vld [vmem:[%s3040_s0 + $0x88] sm:$0xff]  ;;  %v2703_v27 = vpack.c.bf16 %v2980_v10, %v2980_v10 }
 0x1e6   :  { %1495 = vmatprep.subr.bf16.mxu0 %v928_v36  ;;  %1905 = vmatprep.subr.bf16.mxu1 %v930_v28  ;;  %v963_v36 = vunpack.c.l.s8.bf16 %v419_v23  ;;  %v965_v28 = vunpack.c.l.s8.bf16 %v421_v24  ;;  %v439_v24 = vld [vmem:[#allocation3 + $0x7a0] sm:$0xff] }
 0x1e9   :  { %1496 = vmatpush1.bf16.msra.mxu0 %v927_v32  ;;  %1906 = vmatpush1.bf16.msra.mxu1 %v929_v56  ;;  %v424_v32 = vld [vmem:[#allocation3 + $0x728] sm:$0xff]  ;;  %v426_v56 = vld [vmem:[#allocation3 + $0x738] sm:$0xff] }
 0x1ea   :  { %1497 = vmatprep.subr.bf16.mxu0 %v932_v33  ;;  %1907 = vmatprep.subr.bf16.mxu1 %v934_v34  ;;  %v2704_v33 = vpack.c.bf16 %v2999_v51, %v2999_v51  ;;  %v967_v34 = vunpack.c.h.s8.bf16 %v419_v23  ;;  %v972_v10 = vunpack.c.l.s8.bf16 %v424_v32  ;;  %v974_v46 = vunpack.c.l.s8.bf16 %v426_v56 }
 0x1eb   :  { %v976_v51 = vunpack.c.h.s8.bf16 %v424_v32  ;;  %v978_v42 = vunpack.c.h.s8.bf16 %v426_v56  ;;  %v444_v32 = vld [vmem:[#allocation3 + $0x7c8] sm:$0xff]  ;;  %v446_v56 = vld [vmem:[#allocation3 + $0x7d8] sm:$0xff] }
 0x1ed   :  { %1498 = vmatpush1.bf16.msra.mxu0 %v931_v38  ;;  %1908 = vmatpush1.bf16.msra.mxu1 %v933_v39  ;;  %v423_v38 = vld [vmem:[#allocation3 + $0x720] sm:$0xff]  ;;  %v425_v39 = vld [vmem:[#allocation3 + $0x730] sm:$0xff] }
 0x1ee   :  { %1499 = vmatprep.subr.bf16.mxu0 %v936_v40  ;;  %1909 = vmatprep.subr.bf16.mxu1 %v938_v41  ;;  %v971_v40 = vunpack.c.l.s8.bf16 %v423_v38  ;;  %v973_v41 = vunpack.c.l.s8.bf16 %v425_v39 }
 0x1f1   :  { %1500 = vmatpush1.bf16.msra.mxu0 %v935_v44  ;;  %1910 = vmatpush1.bf16.msra.mxu1 %v937_v47  ;;  %v430_v44 = vld [vmem:[#allocation3 + $0x758] sm:$0xff]  ;;  %v975_v47 = vunpack.c.h.s8.bf16 %v423_v38  ;;  %v445_v38 = vld [vmem:[#allocation3 + $0x7d0] sm:$0xff] }
 0x1f2   :  { %1501 = vmatprep.subr.bf16.mxu0 %v940_v20  ;;  %1911 = vmatprep.subr.bf16.mxu1 %v942_v48  ;;  %v977_v20 = vunpack.c.h.s8.bf16 %v425_v39  ;;  %v980_v48 = vunpack.c.l.s8.bf16 %v428_v43  ;;  %v982_v49 = vunpack.c.l.s8.bf16 %v430_v44  ;;  %v986_v58 = vunpack.c.h.s8.bf16 %v430_v44 }
 0x1f5   :  { %1502 = vmatpush1.bf16.msra.mxu0 %v939_v62  ;;  %1912 = vmatpush1.bf16.msra.mxu1 %v941_v53  ;;  %v429_v62 = vld [vmem:[#allocation3 + $0x750] sm:$0xff]  ;;  %v979_v53 = vunpack.c.l.s8.bf16 %v427_v52 }
 0x1f6   :  { %1503 = vmatprep.subr.bf16.mxu0 %v944_v54  ;;  %1913 = vmatprep.subr.bf16.mxu1 %v946_v55  ;;  %v981_v54 = vunpack.c.l.s8.bf16 %v429_v62  ;;  %v984_v55 = vunpack.c.h.s8.bf16 %v428_v43  ;;  %v450_v43 = vld [vmem:[#allocation3 + $0x7f8] sm:$0xff] }
 0x1f9   :  { %1504 = vmatpush1.bf16.msra.mxu0 %v943_v59  ;;  %1914 = vmatpush1.bf16.msra.mxu1 %v945_v60  ;;  %v434_v59 = vld [vmem:[#allocation3 + $0x778] sm:$0xff]  ;;  %v983_v60 = vunpack.c.h.s8.bf16 %v427_v52  ;;  %v449_v52 = vld [vmem:[#allocation3 + $0x7f0] sm:$0xff] }
 0x1fa   :  { %1505 = vmatprep.subr.bf16.mxu0 %v948_v63  ;;  %1915 = vmatprep.subr.bf16.mxu1 %v950_v35  ;;  %v985_v63 = vunpack.c.h.s8.bf16 %v429_v62  ;;  %v988_v35 = vunpack.c.l.s8.bf16 %v432_v31  ;;  %v990_v57 = vunpack.c.l.s8.bf16 %v434_v59  ;;  %v994_v4 = vunpack.c.h.s8.bf16 %v434_v59  ;;  %v100_v62 = vld [vmem:[%s3040_s0 + $0x90] sm:$0xff] }
 0x1fb   :  { %v1026_v59 = vunpack.c.h.s8.bf16 %v450_v43 }
 0x1fd   :  { %1506 = vmatpush1.bf16.msra.mxu0 %v947_v1  ;;  %1916 = vmatpush1.bf16.msra.mxu1 %v949_v2  ;;  %v433_v1 = vld [vmem:[#allocation3 + $0x770] sm:$0xff]  ;;  %v987_v2 = vunpack.c.l.s8.bf16 %v431_v0 }
 0x1fe   :  { %1507 = vmatprep.subr.bf16.mxu0 %v952_v3  ;;  %1917 = vmatprep.subr.bf16.mxu1 %v954_v11  ;;  %v989_v3 = vunpack.c.l.s8.bf16 %v433_v1  ;;  %v992_v11 = vunpack.c.h.s8.bf16 %v432_v31 }
 0x201   :  { %1508 = vmatpush1.bf16.msra.mxu0 %v951_v6  ;;  %1918 = vmatpush1.bf16.msra.mxu1 %v953_v7  ;;  %v438_v6 = vld [vmem:[#allocation3 + $0x798] sm:$0xff]  ;;  %v991_v7 = vunpack.c.h.s8.bf16 %v431_v0 }
 0x202   :  { %1509 = vmatprep.subr.bf16.mxu0 %v956_v45  ;;  %1919 = vmatprep.subr.bf16.mxu1 %v958_v8  ;;  %v993_v45 = vunpack.c.h.s8.bf16 %v433_v1  ;;  %v996_v8 = vunpack.c.l.s8.bf16 %v436_v5  ;;  %v998_v9 = vunpack.c.l.s8.bf16 %v438_v6  ;;  %v1002_v16 = vunpack.c.h.s8.bf16 %v438_v6 }
 0x205   :  { %1510 = vmatpush1.bf16.msra.mxu0 %v955_v21  ;;  %1920 = vmatpush1.bf16.msra.mxu1 %v957_v13  ;;  %v437_v21 = vld [vmem:[#allocation3 + $0x790] sm:$0xff]  ;;  %v995_v13 = vunpack.c.l.s8.bf16 %v435_v12 }
 0x206   :  { %1511 = vmatprep.subr.bf16.mxu0 %v960_v14  ;;  %1921 = vmatprep.subr.bf16.mxu1 %v962_v15  ;;  %v997_v14 = vunpack.c.l.s8.bf16 %v437_v21  ;;  %v1000_v15 = vunpack.c.h.s8.bf16 %v436_v5 }
 0x209   :  { %1512 = vmatpush1.bf16.msra.mxu0 %v959_v18  ;;  %1922 = vmatpush1.bf16.msra.mxu1 %v961_v19  ;;  %v442_v18 = vld [vmem:[#allocation3 + $0x7b8] sm:$0xff]  ;;  %v999_v19 = vunpack.c.h.s8.bf16 %v435_v12 }
 0x20a   :  { %1522 = vmatprep.subr.bf16.mxu0 %v964_v22  ;;  %1932 = vmatprep.subr.bf16.mxu1 %v966_v61  ;;  %v1001_v22 = vunpack.c.h.s8.bf16 %v437_v21  ;;  %v1004_v61 = vunpack.c.l.s8.bf16 %v440_v17  ;;  %v1006_v23 = vunpack.c.l.s8.bf16 %v442_v18 }
 0x20c   :  { %1514 = vmatmul.mubr.bf16.vlgmr.msra.gmra.mrb[0].mxu0 %v2703_v27  ;;  %1924 = vmatmul.mubr.bf16.vlgmr.msra.gmra.mrb[0].mxu1 %v2703_v27  ;;  %v441_v27 = vld [vmem:[#allocation3 + $0x7b0] sm:$0xff] }
 0x20d   :  { %1523 = vmatpush1.bf16.msra.mxu0 %v963_v36  ;;  %1933 = vmatpush1.bf16.msra.mxu1 %v965_v28  ;;  %v1003_v36 = vunpack.c.l.s8.bf16 %v439_v24  ;;  %v1005_v28 = vunpack.c.l.s8.bf16 %v441_v27 }
 0x20e   :  { %1524 = vmatprep.subr.bf16.mxu0 %v968_v29  ;;  %1934 = vmatprep.subr.bf16.mxu1 %v970_v30  ;;  %v1008_v29 = vunpack.c.h.s8.bf16 %v440_v17  ;;  %v1010_v30 = vunpack.c.h.s8.bf16 %v442_v18 }
 0x20f   :  { %1554 = vmatprep.mubr.bf16.mxu0 %v2704_v33  ;;  %1964 = vmatprep.mubr.bf16.mxu1 %v2704_v33  ;;  %v1007_v33 = vunpack.c.h.s8.bf16 %v439_v24 }
 0x211   :  { %1525 = vmatpush1.bf16.msra.mxu0 %v967_v34  ;;  %1935 = vmatpush1.bf16.msra.mxu1 %v969_v37  ;;  %v1009_v34 = vunpack.c.h.s8.bf16 %v441_v27  ;;  %v1012_v37 = vunpack.c.l.s8.bf16 %v444_v32 }
 0x212   :  { %1526 = vmatprep.subr.bf16.mxu0 %v972_v10  ;;  %1936 = vmatprep.subr.bf16.mxu1 %v974_v46  ;;  %v1014_v10 = vunpack.c.l.s8.bf16 %v446_v56  ;;  %v443_v46 = vld [vmem:[#allocation3 + $0x7c0] sm:$0xff] }
 0x213   :  { %v1011_v39 = vunpack.c.l.s8.bf16 %v443_v46  ;;  %v1015_v44 = vunpack.c.h.s8.bf16 %v443_v46 }
 0x215   :  { %1527 = vmatpush1.bf16.msra.mxu0 %v971_v40  ;;  %1937 = vmatpush1.bf16.msra.mxu1 %v973_v41  ;;  %v1013_v40 = vunpack.c.l.s8.bf16 %v445_v38  ;;  %v1016_v41 = vunpack.c.h.s8.bf16 %v444_v32 }
 0x216   :  { %1528 = vmatprep.subr.bf16.mxu0 %v976_v51  ;;  %1938 = vmatprep.subr.bf16.mxu1 %v978_v42  ;;  %v1018_v51 = vunpack.c.h.s8.bf16 %v446_v56  ;;  %v448_v42 = vld [vmem:[#allocation3 + $0x7e8] sm:$0xff] }
 0x217   :  { %v1024_v31 = vunpack.c.h.s8.bf16 %v448_v42 }
 0x219   :  { %1529 = vmatpush1.bf16.msra.mxu0 %v975_v47  ;;  %1939 = vmatpush1.bf16.msra.mxu1 %v977_v20  ;;  %v1017_v47 = vunpack.c.h.s8.bf16 %v445_v38  ;;  %v447_v20 = vld [vmem:[#allocation3 + $0x7e0] sm:$0xff] }
 0x21a   :  { %1530 = vmatprep.subr.bf16.mxu0 %v980_v48  ;;  %1940 = vmatprep.subr.bf16.mxu1 %v982_v49  ;;  %v1020_v48 = vunpack.c.l.s8.bf16 %v448_v42  ;;  %v1022_v49 = vunpack.c.l.s8.bf16 %v450_v43 }
 0x21d   :  { %1531 = vmatpush1.bf16.msra.mxu0 %v979_v53  ;;  %1941 = vmatpush1.bf16.msra.mxu1 %v981_v54  ;;  %v101_v53 = vld [vmem:[%s3040_s0 + $0x98] sm:$0xff] }
 0x21e   :  { %1532 = vmatprep.subr.bf16.mxu0 %v984_v55  ;;  %1942 = vmatprep.subr.bf16.mxu1 %v986_v58  ;;  %v2530_v54 = vpack.c.bf16 %v101_v53, %v100_v62  ;;  %v1019_v55 = vunpack.c.l.s8.bf16 %v447_v20  ;;  %v1021_v58 = vunpack.c.l.s8.bf16 %v449_v52  ;;  %v467_v62 = vld [vmem:[#allocation3 + $0x880] sm:$0xff]  ;;  %v469_v53 = vld [vmem:[#allocation3 + $0x890] sm:$0xff] }
 0x220   :  { %194 = vst.msk [vmem:[#allocation2 + $0x48] sm:$0xff] %vm193_vm2, %v2530_v54  ;;  %v1059_v54 = vunpack.c.l.s8.bf16 %v467_v62 }
 0x221   :  { %1533 = vmatpush1.bf16.msra.mxu0 %v983_v60  ;;  %1943 = vmatpush1.bf16.msra.mxu1 %v985_v63  ;;  %v452_v60 = vld [vmem:[#allocation3 + $0x808] sm:$0xff]  ;;  %v454_v63 = vld [vmem:[#allocation3 + $0x818] sm:$0xff] }
 0x222   :  { %1534 = vmatprep.subr.bf16.mxu0 %v988_v35  ;;  %1944 = vmatprep.subr.bf16.mxu1 %v990_v57  ;;  %v1023_v35 = vunpack.c.h.s8.bf16 %v447_v20  ;;  %v1025_v57 = vunpack.c.h.s8.bf16 %v449_v52  ;;  %v1028_v0 = vunpack.c.l.s8.bf16 %v452_v60  ;;  %v1030_v1 = vunpack.c.l.s8.bf16 %v454_v63 }
 0x223   :  { %v1032_v6 = vunpack.c.h.s8.bf16 %v452_v60  ;;  %v474_v60 = vld [vmem:[#allocation3 + $0x8b8] sm:$0xff] }
 0x225   :  { %1535 = vmatpush1.bf16.msra.mxu0 %v987_v2  ;;  %1945 = vmatpush1.bf16.msra.mxu1 %v989_v3  ;;  %v451_v2 = vld [vmem:[#allocation3 + $0x800] sm:$0xff]  ;;  %v453_v3 = vld [vmem:[#allocation3 + $0x810] sm:$0xff] }
 0x226   :  { %1536 = vmatprep.subr.bf16.mxu0 %v992_v11  ;;  %1946 = vmatprep.subr.bf16.mxu1 %v994_v4  ;;  %v2705_v11 = vpack.c.bf16 %v2994_v50, %v2994_v50  ;;  %v1027_v4 = vunpack.c.l.s8.bf16 %v451_v2  ;;  %v1029_v5 = vunpack.c.l.s8.bf16 %v453_v3  ;;  %v1031_v12 = vunpack.c.h.s8.bf16 %v451_v2  ;;  %v473_v2 = vld [vmem:[#allocation3 + $0x8b0] sm:$0xff] }
 0x227   :  { %v1033_v21 = vunpack.c.h.s8.bf16 %v453_v3 }
 0x229   :  { %1537 = vmatpush1.bf16.msra.mxu0 %v991_v7  ;;  %1947 = vmatpush1.bf16.msra.mxu1 %v993_v45  ;;  %v1034_v7 = vunpack.c.h.s8.bf16 %v454_v63  ;;  %v456_v45 = vld [vmem:[#allocation3 + $0x828] sm:$0xff]  ;;  %v1063_v63 = vunpack.c.h.s8.bf16 %v467_v62  ;;  %v489_v62 = vld [vmem:[#allocation3 + $0x930] sm:$0xff] }
 0x22a   :  { %1538 = vmatprep.subr.bf16.mxu0 %v996_v8  ;;  %1948 = vmatprep.subr.bf16.mxu1 %v998_v9  ;;  %v458_v8 = vld [vmem:[#allocation3 + $0x838] sm:$0xff]  ;;  %v2706_v9 = vpack.c.bf16 %v3013_v26, %v3013_v26  ;;  %v1036_v50 = vunpack.c.l.s8.bf16 %v456_v45  ;;  %v1040_v26 = vunpack.c.h.s8.bf16 %v456_v45 }
 0x22b   :  { %v1042_v18 = vunpack.c.h.s8.bf16 %v458_v8 }
 0x22d   :  { %1539 = vmatpush1.bf16.msra.mxu0 %v995_v13  ;;  %1949 = vmatpush1.bf16.msra.mxu1 %v997_v14  ;;  %v1038_v13 = vunpack.c.l.s8.bf16 %v458_v8  ;;  %v455_v14 = vld [vmem:[#allocation3 + $0x820] sm:$0xff]  ;;  %v1073_v8 = vunpack.c.h.s8.bf16 %v473_v2 }
 0x22e   :  { %1540 = vmatprep.subr.bf16.mxu0 %v1000_v15  ;;  %1950 = vmatprep.subr.bf16.mxu1 %v1002_v16  ;;  %v457_v15 = vld [vmem:[#allocation3 + $0x830] sm:$0xff]  ;;  %v1035_v16 = vunpack.c.l.s8.bf16 %v455_v14 }
 0x22f   :  { %v1037_v17 = vunpack.c.l.s8.bf16 %v457_v15 }
 0x231   :  { %1541 = vmatpush1.bf16.msra.mxu0 %v999_v19  ;;  %1951 = vmatpush1.bf16.msra.mxu1 %v1001_v22  ;;  %v460_v19 = vld [vmem:[#allocation3 + $0x848] sm:$0xff]  ;;  %v462_v22 = vld [vmem:[#allocation3 + $0x858] sm:$0xff] }
 0x232   :  { %1542 = vmatprep.subr.bf16.mxu0 %v1004_v61  ;;  %1952 = vmatprep.subr.bf16.mxu1 %v1006_v23  ;;  %v1039_v61 = vunpack.c.h.s8.bf16 %v455_v14  ;;  %v1041_v23 = vunpack.c.h.s8.bf16 %v457_v15  ;;  %v1044_v24 = vunpack.c.l.s8.bf16 %v460_v19  ;;  %v1046_v27 = vunpack.c.l.s8.bf16 %v462_v22 }
 0x233   :  { %v1048_v32 = vunpack.c.h.s8.bf16 %v460_v19  ;;  %v1050_v56 = vunpack.c.h.s8.bf16 %v462_v22 }
 0x235   :  { %1543 = vmatpush1.bf16.msra.mxu0 %v1003_v36  ;;  %1953 = vmatpush1.bf16.msra.mxu1 %v1005_v28  ;;  %v459_v36 = vld [vmem:[#allocation3 + $0x840] sm:$0xff]  ;;  %v461_v28 = vld [vmem:[#allocation3 + $0x850] sm:$0xff] }
 0x236   :  { %1544 = vmatprep.subr.bf16.mxu0 %v1008_v29  ;;  %1954 = vmatprep.subr.bf16.mxu1 %v1010_v30  ;;  %v1043_v29 = vunpack.c.l.s8.bf16 %v459_v36  ;;  %v1045_v30 = vunpack.c.l.s8.bf16 %v461_v28 }
 0x239   :  { %1545 = vmatpush1.bf16.msra.mxu0 %v1007_v33  ;;  %1955 = vmatpush1.bf16.msra.mxu1 %v1009_v34  ;;  %v464_v33 = vld [vmem:[#allocation3 + $0x868] sm:$0xff]  ;;  %v466_v34 = vld [vmem:[#allocation3 + $0x878] sm:$0xff] }
 0x23a   :  { %1546 = vmatprep.subr.bf16.mxu0 %v1012_v37  ;;  %1956 = vmatprep.subr.bf16.mxu1 %v1014_v10  ;;  %v1047_v37 = vunpack.c.h.s8.bf16 %v459_v36  ;;  %v1049_v10 = vunpack.c.h.s8.bf16 %v461_v28  ;;  %v1052_v46 = vunpack.c.l.s8.bf16 %v464_v33  ;;  %v1054_v38 = vunpack.c.l.s8.bf16 %v466_v34 }
 0x23b   :  { %v1056_v42 = vunpack.c.h.s8.bf16 %v464_v33  ;;  %v1058_v43 = vunpack.c.h.s8.bf16 %v466_v34 }
 0x23d   :  { %1547 = vmatpush1.bf16.msra.mxu0 %v1011_v39  ;;  %1957 = vmatpush1.bf16.msra.mxu1 %v1013_v40  ;;  %v463_v39 = vld [vmem:[#allocation3 + $0x860] sm:$0xff]  ;;  %v465_v40 = vld [vmem:[#allocation3 + $0x870] sm:$0xff] }
 0x23e   :  { %1548 = vmatprep.subr.bf16.mxu0 %v1016_v41  ;;  %1958 = vmatprep.subr.bf16.mxu1 %v1018_v51  ;;  %v1051_v41 = vunpack.c.l.s8.bf16 %v463_v39  ;;  %v1053_v51 = vunpack.c.l.s8.bf16 %v465_v40  ;;  %v1055_v20 = vunpack.c.h.s8.bf16 %v463_v39  ;;  %v3031_v39 = vld [vmem:[#allocation2 + $0x48] sm:$0xff] }
 0x241   :  { %1549 = vmatpush1.bf16.msra.mxu0 %v1015_v44  ;;  %1959 = vmatpush1.bf16.msra.mxu1 %v1017_v47  ;;  %v468_v44 = vld [vmem:[#allocation3 + $0x888] sm:$0xff]  ;;  %v470_v47 = vld [vmem:[#allocation3 + $0x898] sm:$0xff] }
 0x242   :  { %1550 = vmatprep.subr.bf16.mxu0 %v1020_v48  ;;  %1960 = vmatprep.subr.bf16.mxu1 %v1022_v49  ;;  %v1057_v48 = vunpack.c.h.s8.bf16 %v465_v40  ;;  %v1060_v49 = vunpack.c.l.s8.bf16 %v468_v44  ;;  %v1062_v52 = vunpack.c.l.s8.bf16 %v470_v47 }
 0x245   :  { %1551 = vmatpush1.bf16.msra.mxu0 %v1019_v55  ;;  %1961 = vmatpush1.bf16.msra.mxu1 %v1021_v58  ;;  %v1061_v55 = vunpack.c.l.s8.bf16 %v469_v53  ;;  %v1064_v58 = vunpack.c.h.s8.bf16 %v468_v44  ;;  %v490_v44 = vld [vmem:[#allocation3 + $0x938] sm:$0xff] }
 0x246   :  { %1552 = vmatprep.subr.bf16.mxu0 %v1024_v31  ;;  %1962 = vmatprep.subr.bf16.mxu1 %v1026_v59  ;;  %v1066_v31 = vunpack.c.h.s8.bf16 %v470_v47  ;;  %v472_v59 = vld [vmem:[#allocation3 + $0x8a8] sm:$0xff]  ;;  %v2488_v47 = vcombine.high %v3031_v39, %v3031_v39 }
 0x249   :  { %1553 = vmatpush1.bf16.msra.mxu0 %v1023_v35  ;;  %1963 = vmatpush1.bf16.msra.mxu1 %v1025_v57  ;;  %v1065_v35 = vunpack.c.h.s8.bf16 %v469_v53  ;;  %v1068_v57 = vunpack.c.l.s8.bf16 %v472_v59 }
 0x24a   :  { %1563 = vmatprep.subr.bf16.mxu0 %v1028_v0  ;;  %1973 = vmatprep.subr.bf16.mxu1 %v1030_v1  ;;  %v1070_v0 = vunpack.c.l.s8.bf16 %v474_v60  ;;  %v471_v1 = vld [vmem:[#allocation3 + $0x8a0] sm:$0xff] }
 0x24b   :  { %v1067_v3 = vunpack.c.l.s8.bf16 %v471_v1  ;;  %v1071_v45 = vunpack.c.h.s8.bf16 %v471_v1  ;;  %v493_v1 = vld [vmem:[#allocation3 + $0x950] sm:$0xff] }
 0x24c   :  { %1555 = vmatmul.mubr.bf16.vlgmr.msra.gmra.mrb[0].mxu0 %v2705_v11  ;;  %1965 = vmatmul.mubr.bf16.vlgmr.msra.gmra.mrb[0].mxu1 %v2705_v11  ;;  %v1069_v11 = vunpack.c.l.s8.bf16 %v473_v2 }
 0x24d   :  { %1564 = vmatpush1.bf16.msra.mxu0 %v1027_v4  ;;  %1974 = vmatpush1.bf16.msra.mxu1 %v1029_v5  ;;  %v1072_v4 = vunpack.c.h.s8.bf16 %v472_v59  ;;  %v1074_v5 = vunpack.c.h.s8.bf16 %v474_v60  ;;  %v494_v59 = vld [vmem:[#allocation3 + $0x958] sm:$0xff] }
 0x24e   :  { %1565 = vmatprep.subr.bf16.mxu0 %v1032_v6  ;;  %1975 = vmatprep.subr.bf16.mxu1 %v1034_v7  ;;  %v476_v6 = vld [vmem:[#allocation3 + $0x8c8] sm:$0xff]  ;;  %v478_v7 = vld [vmem:[#allocation3 + $0x8d8] sm:$0xff] }
 0x24f   :  { %1595 = vmatprep.mubr.bf16.mxu0 %v2706_v9  ;;  %2005 = vmatprep.mubr.bf16.mxu1 %v2706_v9  ;;  %v1076_v9 = vunpack.c.l.s8.bf16 %v476_v6  ;;  %v1080_v15 = vunpack.c.h.s8.bf16 %v476_v6  ;;  %v498_v6 = vld [vmem:[#allocation3 + $0x978] sm:$0xff] }
 0x251   :  { %1566 = vmatpush1.bf16.msra.mxu0 %v1031_v12  ;;  %1976 = vmatpush1.bf16.msra.mxu1 %v1033_v21  ;;  %v1078_v12 = vunpack.c.l.s8.bf16 %v478_v7  ;;  %v475_v21 = vld [vmem:[#allocation3 + $0x8c0] sm:$0xff] }
 0x252   :  { %1567 = vmatprep.subr.bf16.mxu0 %v1036_v50  ;;  %1977 = vmatprep.subr.bf16.mxu1 %v1038_v13  ;;  %v477_v50 = vld [vmem:[#allocation3 + $0x8d0] sm:$0xff]  ;;  %v1075_v13 = vunpack.c.l.s8.bf16 %v475_v21 }
 0x253   :  { %v1077_v14 = vunpack.c.l.s8.bf16 %v477_v50  ;;  %v1081_v19 = vunpack.c.h.s8.bf16 %v477_v50 }
 0x255   :  { %1568 = vmatpush1.bf16.msra.mxu0 %v1035_v16  ;;  %1978 = vmatpush1.bf16.msra.mxu1 %v1037_v17  ;;  %v1082_v16 = vunpack.c.h.s8.bf16 %v478_v7  ;;  %v480_v17 = vld [vmem:[#allocation3 + $0x8e8] sm:$0xff] }
 0x256   :  { %1569 = vmatprep.subr.bf16.mxu0 %v1040_v26  ;;  %1979 = vmatprep.subr.bf16.mxu1 %v1042_v18  ;;  %v482_v26 = vld [vmem:[#allocation3 + $0x8f8] sm:$0xff]  ;;  %v1079_v18 = vunpack.c.h.s8.bf16 %v475_v21  ;;  %v1084_v22 = vunpack.c.l.s8.bf16 %v480_v17  ;;  %v1088_v28 = vunpack.c.h.s8.bf16 %v480_v17  ;;  %v497_v21 = vld [vmem:[#allocation3 + $0x970] sm:$0xff] }
 0x257   :  { %v502_v17 = vld [vmem:[#allocation3 + $0x998] sm:$0xff] }
 0x259   :  { %1570 = vmatpush1.bf16.msra.mxu0 %v1039_v61  ;;  %1980 = vmatpush1.bf16.msra.mxu1 %v1041_v23  ;;  %v1086_v61 = vunpack.c.l.s8.bf16 %v482_v26  ;;  %v479_v23 = vld [vmem:[#allocation3 + $0x8e0] sm:$0xff] }
 0x25a   :  { %1571 = vmatprep.subr.bf16.mxu0 %v1044_v24  ;;  %1981 = vmatprep.subr.bf16.mxu1 %v1046_v27  ;;  %v481_v24 = vld [vmem:[#allocation3 + $0x8f0] sm:$0xff]  ;;  %v1083_v27 = vunpack.c.l.s8.bf16 %v479_v23 }
 0x25b   :  { %v1085_v36 = vunpack.c.l.s8.bf16 %v481_v24  ;;  %v1089_v33 = vunpack.c.h.s8.bf16 %v481_v24 }
 0x25d   :  { %1572 = vmatpush1.bf16.msra.mxu0 %v1043_v29  ;;  %1982 = vmatpush1.bf16.msra.mxu1 %v1045_v30  ;;  %v1090_v29 = vunpack.c.h.s8.bf16 %v482_v26  ;;  %v484_v30 = vld [vmem:[#allocation3 + $0x908] sm:$0xff] }
 0x25e   :  { %1573 = vmatprep.subr.bf16.mxu0 %v1048_v32  ;;  %1983 = vmatprep.subr.bf16.mxu1 %v1050_v56  ;;  %v486_v32 = vld [vmem:[#allocation3 + $0x918] sm:$0xff]  ;;  %v1087_v56 = vunpack.c.h.s8.bf16 %v479_v23  ;;  %v1092_v34 = vunpack.c.l.s8.bf16 %v484_v30  ;;  %v501_v23 = vld [vmem:[#allocation3 + $0x990] sm:$0xff] }
 0x261   :  { %1574 = vmatpush1.bf16.msra.mxu0 %v1047_v37  ;;  %1984 = vmatpush1.bf16.msra.mxu1 %v1049_v10  ;;  %v1094_v37 = vunpack.c.l.s8.bf16 %v486_v32  ;;  %v483_v10 = vld [vmem:[#allocation3 + $0x900] sm:$0xff] }
 0x262   :  { %1575 = vmatprep.subr.bf16.mxu0 %v1052_v46  ;;  %1985 = vmatprep.subr.bf16.mxu1 %v1054_v38  ;;  %v485_v46 = vld [vmem:[#allocation3 + $0x910] sm:$0xff]  ;;  %v2707_v38 = vpack.c.bf16 %v3008_v25, %v3008_v25  ;;  %v1091_v40 = vunpack.c.l.s8.bf16 %v483_v10  ;;  %v1095_v25 = vunpack.c.h.s8.bf16 %v483_v10 }
 0x263   :  { %v505_v10 = vld [vmem:[#allocation3 + $0x9b0] sm:$0xff] }
 0x265   :  { %1576 = vmatpush1.bf16.msra.mxu0 %v1051_v41  ;;  %1986 = vmatpush1.bf16.msra.mxu1 %v1053_v51  ;;  %v1093_v41 = vunpack.c.l.s8.bf16 %v485_v46  ;;  %v1096_v51 = vunpack.c.h.s8.bf16 %v484_v30  ;;  %v506_v30 = vld [vmem:[#allocation3 + $0x9b8] sm:$0xff] }
 0x266   :  { %1577 = vmatprep.subr.bf16.mxu0 %v1056_v42  ;;  %1987 = vmatprep.subr.bf16.mxu1 %v1058_v43  ;;  %v1098_v42 = vunpack.c.h.s8.bf16 %v486_v32  ;;  %v488_v43 = vld [vmem:[#allocation3 + $0x928] sm:$0xff] }
 0x269   :  { %1578 = vmatpush1.bf16.msra.mxu0 %v1055_v20  ;;  %1988 = vmatpush1.bf16.msra.mxu1 %v1057_v48  ;;  %v1097_v20 = vunpack.c.h.s8.bf16 %v485_v46  ;;  %v1100_v48 = vunpack.c.l.s8.bf16 %v488_v43 }
 0x26a   :  { %1579 = vmatprep.subr.bf16.mxu0 %v1060_v49  ;;  %1989 = vmatprep.subr.bf16.mxu1 %v1062_v52  ;;  %v1102_v49 = vunpack.c.l.s8.bf16 %v490_v44  ;;  %v487_v52 = vld [vmem:[#allocation3 + $0x920] sm:$0xff] }
 0x26b   :  { %v1099_v53 = vunpack.c.l.s8.bf16 %v487_v52  ;;  %v1103_v60 = vunpack.c.h.s8.bf16 %v487_v52 }
 0x26d   :  { %1580 = vmatpush1.bf16.msra.mxu0 %v1059_v54  ;;  %1990 = vmatpush1.bf16.msra.mxu1 %v1061_v55  ;;  %v1101_v54 = vunpack.c.l.s8.bf16 %v489_v62  ;;  %v1104_v55 = vunpack.c.h.s8.bf16 %v488_v43 }
 0x26e   :  { %1581 = vmatprep.subr.bf16.mxu0 %v1064_v58  ;;  %1991 = vmatprep.subr.bf16.mxu1 %v1066_v31  ;;  %v1106_v58 = vunpack.c.h.s8.bf16 %v490_v44  ;;  %v492_v31 = vld [vmem:[#allocation3 + $0x948] sm:$0xff]  ;;  %v1137_v44 = vunpack.c.h.s8.bf16 %v505_v10 }
 0x271   :  { %1582 = vmatpush1.bf16.msra.mxu0 %v1063_v63  ;;  %1992 = vmatpush1.bf16.msra.mxu1 %v1065_v35  ;;  %v1105_v63 = vunpack.c.h.s8.bf16 %v489_v62  ;;  %v1108_v35 = vunpack.c.l.s8.bf16 %v492_v31 }
 0x272   :  { %1583 = vmatprep.subr.bf16.mxu0 %v1068_v57  ;;  %1993 = vmatprep.subr.bf16.mxu1 %v1070_v0  ;;  %v1110_v57 = vunpack.c.l.s8.bf16 %v494_v59  ;;  %v491_v0 = vld [vmem:[#allocation3 + $0x940] sm:$0xff] }
 0x273   :  { %v1107_v2 = vunpack.c.l.s8.bf16 %v491_v0  ;;  %v1111_v7 = vunpack.c.h.s8.bf16 %v491_v0 }
 0x275   :  { %1584 = vmatpush1.bf16.msra.mxu0 %v1067_v3  ;;  %1994 = vmatpush1.bf16.msra.mxu1 %v1069_v11  ;;  %v1109_v3 = vunpack.c.l.s8.bf16 %v493_v1  ;;  %v1112_v11 = vunpack.c.h.s8.bf16 %v492_v31 }
 0x276   :  { %1585 = vmatprep.subr.bf16.mxu0 %v1072_v4  ;;  %1995 = vmatprep.subr.bf16.mxu1 %v1074_v5  ;;  %v1114_v4 = vunpack.c.h.s8.bf16 %v494_v59  ;;  %v496_v5 = vld [vmem:[#allocation3 + $0x968] sm:$0xff] }
 0x279   :  { %1586 = vmatpush1.bf16.msra.mxu0 %v1071_v45  ;;  %1996 = vmatpush1.bf16.msra.mxu1 %v1073_v8  ;;  %v1113_v45 = vunpack.c.h.s8.bf16 %v493_v1  ;;  %v1116_v8 = vunpack.c.l.s8.bf16 %v496_v5 }
 0x27a   :  { %1587 = vmatprep.subr.bf16.mxu0 %v1076_v9  ;;  %1997 = vmatprep.subr.bf16.mxu1 %v1078_v12  ;;  %v1118_v9 = vunpack.c.l.s8.bf16 %v498_v6  ;;  %v495_v12 = vld [vmem:[#allocation3 + $0x960] sm:$0xff] }
 0x27b   :  { %v1115_v50 = vunpack.c.l.s8.bf16 %v495_v12  ;;  %v1119_v26 = vunpack.c.h.s8.bf16 %v495_v12  ;;  %v2664_v12 = vld [vmem:[#allocation8 + $0x8] sm:$0xff]  }
 0x27d   :  { %1588 = vmatpush1.bf16.msra.mxu0 %v1075_v13  ;;  %1998 = vmatpush1.bf16.msra.mxu1 %v1077_v14  ;;  %v1117_v13 = vunpack.c.l.s8.bf16 %v497_v21  ;;  %v1120_v14 = vunpack.c.h.s8.bf16 %v496_v5  ;;  %v2659_v5 = vld [vmem:[#allocation8 + $0xc0] sm:$0xff]  }
 0x27e   :  { %1589 = vmatprep.subr.bf16.mxu0 %v1080_v15  ;;  %1999 = vmatprep.subr.bf16.mxu1 %v1082_v16  ;;  %v1122_v15 = vunpack.c.h.s8.bf16 %v498_v6  ;;  %v500_v16 = vld [vmem:[#allocation3 + $0x988] sm:$0xff]  ;;  %v2487_v6 = vcombine.low %v3031_v39, %v3031_v39  ;;  %v2668_v39 = vld [vmem:[#allocation8 + $0x10] sm:$0xff]  }
 0x281   :  { %1590 = vmatpush1.bf16.msra.mxu0 %v1079_v18  ;;  %2000 = vmatpush1.bf16.msra.mxu1 %v1081_v19  ;;  %v1121_v18 = vunpack.c.h.s8.bf16 %v497_v21  ;;  %v1124_v19 = vunpack.c.l.s8.bf16 %v500_v16  ;;  %v2665_v21 = vld [vmem:[#allocation8 + $0x88] sm:$0xff]  }
 0x282   :  { %1591 = vmatprep.subr.bf16.mxu0 %v1084_v22  ;;  %2001 = vmatprep.subr.bf16.mxu1 %v1086_v61  ;;  %v1126_v22 = vunpack.c.l.s8.bf16 %v502_v17  ;;  %v499_v61 = vld [vmem:[#allocation3 + $0x980] sm:$0xff] }
 0x283   :  { %v1123_v24 = vunpack.c.l.s8.bf16 %v499_v61  ;;  %v1127_v32 = vunpack.c.h.s8.bf16 %v499_v61  ;;  %v2677_v61 = vld [vmem:[#allocation8 + $0xa0] sm:$0xff]  }
 0x285   :  { %1592 = vmatpush1.bf16.msra.mxu0 %v1083_v27  ;;  %2002 = vmatpush1.bf16.msra.mxu1 %v1085_v36  ;;  %v1125_v27 = vunpack.c.l.s8.bf16 %v501_v23  ;;  %v1128_v36 = vunpack.c.h.s8.bf16 %v500_v16  ;;  %v2671_v16 = vld [vmem:[#allocation8 + $0xd8] sm:$0xff]  }
 0x286   :  { %1593 = vmatprep.subr.bf16.mxu0 %v1088_v28  ;;  %2003 = vmatprep.subr.bf16.mxu1 %v1090_v29  ;;  %v1130_v28 = vunpack.c.h.s8.bf16 %v502_v17  ;;  %v504_v29 = vld [vmem:[#allocation3 + $0x9a8] sm:$0xff]  ;;  %v2672_v17 = vld [vmem:[#allocation8 + $0x18] sm:$0xff]  }
 0x289   :  { %1594 = vmatpush1.bf16.msra.mxu0 %v1087_v56  ;;  %2004 = vmatpush1.bf16.msra.mxu1 %v1089_v33  ;;  %v1129_v56 = vunpack.c.h.s8.bf16 %v501_v23  ;;  %v1132_v33 = vunpack.c.l.s8.bf16 %v504_v29  ;;  %v2678_v23 = vld [vmem:[#allocation8 + $0x68] sm:$0xff]  }
 0x28a   :  { %1604 = vmatprep.subr.bf16.mxu0 %v1092_v34  ;;  %2014 = vmatprep.subr.bf16.mxu1 %v1094_v37  ;;  %v1134_v34 = vunpack.c.l.s8.bf16 %v506_v30  ;;  %v503_v37 = vld [vmem:[#allocation3 + $0x9a0] sm:$0xff] }
 0x28b   :  { %v1131_v46 = vunpack.c.l.s8.bf16 %v503_v37  ;;  %v1135_v43 = vunpack.c.h.s8.bf16 %v503_v37  ;;  %v2689_v37 = vld [vmem:[#allocation8 + $0xb8] sm:$0xff]  }
 0x28c   :  { %1596 = vmatmul.mubr.bf16.vlgmr.msra.gmra.mrb[0].mxu0 %v2707_v38  ;;  %2006 = vmatmul.mubr.bf16.vlgmr.msra.gmra.mrb[0].mxu1 %v2707_v38  ;;  %v1133_v38 = vunpack.c.l.s8.bf16 %v505_v10  ;;  %v2057_v10 = vlaneseq }
 0x28d   :  { %1605 = vmatpush1.bf16.msra.mxu0 %v1091_v40  ;;  %2015 = vmatpush1.bf16.msra.mxu1 %v1093_v41  ;;  %v1136_v40 = vunpack.c.h.s8.bf16 %v504_v29  ;;  %v1138_v41 = vunpack.c.h.s8.bf16 %v506_v30  ;;  %v2683_v29 = vld [vmem:[#allocation8 + $0xf0] sm:$0xff]  }
 0x28e   :  { %1606 = vmatprep.subr.bf16.mxu0 %v1096_v51  ;;  %2016 = vmatprep.subr.bf16.mxu1 %v1098_v42  ;;  %v508_v51 = vld [vmem:[#allocation3 + $0x9c8] sm:$0xff]  ;;  %v510_v42 = vld [vmem:[#allocation3 + $0x9d8] sm:$0xff] }
 0x28f   :  { %1636 = vmatprep.mubr.bf16.mxu0 %v2488_v47  ;;  %2046 = vmatprep.mubr.bf16.mxu1 %v2488_v47  ;;  %v1140_v47 = vunpack.c.l.s8.bf16 %v508_v51  ;;  %v1144_v62 = vunpack.c.h.s8.bf16 %v508_v51  ;;  %v2684_v30 = vld [vmem:[#allocation8 + $0x30] sm:$0xff]  }
 0x291   :  { %1607 = vmatpush1.bf16.msra.mxu0 %v1095_v25  ;;  %2017 = vmatpush1.bf16.msra.mxu1 %v1097_v20  ;;  %v1142_v25 = vunpack.c.l.s8.bf16 %v510_v42  ;;  %v507_v20 = vld [vmem:[#allocation3 + $0x9c0] sm:$0xff] }
 0x292   :  { %1608 = vmatprep.subr.bf16.mxu0 %v1100_v48  ;;  %2018 = vmatprep.subr.bf16.mxu1 %v1102_v49  ;;  %v509_v48 = vld [vmem:[#allocation3 + $0x9d0] sm:$0xff]  ;;  %v1139_v49 = vunpack.c.l.s8.bf16 %v507_v20 }
 0x293   :  { %v1141_v52 = vunpack.c.l.s8.bf16 %v509_v48  ;;  %v1145_v31 = vunpack.c.h.s8.bf16 %v509_v48 }
 0x295   :  { %1609 = vmatpush1.bf16.msra.mxu0 %v1099_v53  ;;  %2019 = vmatpush1.bf16.msra.mxu1 %v1101_v54  ;;  %v1146_v53 = vunpack.c.h.s8.bf16 %v510_v42  ;;  %v512_v54 = vld [vmem:[#allocation3 + $0x9e8] sm:$0xff] }
 0x296   :  { %1610 = vmatprep.subr.bf16.mxu0 %v1104_v55  ;;  %2020 = vmatprep.subr.bf16.mxu1 %v1106_v58  ;;  %v514_v55 = vld [vmem:[#allocation3 + $0x9f8] sm:$0xff]  ;;  %v1143_v58 = vunpack.c.h.s8.bf16 %v507_v20  ;;  %v1148_v59 = vunpack.c.l.s8.bf16 %v512_v54  ;;  %v1152_v1 = vunpack.c.h.s8.bf16 %v512_v54 }
 0x299   :  { %1611 = vmatpush1.bf16.msra.mxu0 %v1103_v60  ;;  %2021 = vmatpush1.bf16.msra.mxu1 %v1105_v63  ;;  %v1150_v60 = vunpack.c.l.s8.bf16 %v514_v55  ;;  %v511_v63 = vld [vmem:[#allocation3 + $0x9e0] sm:$0xff] }
 0x29a   :  { %1612 = vmatprep.subr.bf16.mxu0 %v1108_v35  ;;  %2022 = vmatprep.subr.bf16.mxu1 %v1110_v57  ;;  %v513_v35 = vld [vmem:[#allocation3 + $0x9f0] sm:$0xff]  ;;  %v1147_v57 = vunpack.c.l.s8.bf16 %v511_v63 }
 0x29b   :  { %v1149_v0 = vunpack.c.l.s8.bf16 %v513_v35 }
 0x29d   :  { %1613 = vmatpush1.bf16.msra.mxu0 %v1107_v2  ;;  %2023 = vmatpush1.bf16.msra.mxu1 %v1109_v3  ;;  %v1154_v2 = vunpack.c.h.s8.bf16 %v514_v55  ;;  %v1151_v3 = vunpack.c.h.s8.bf16 %v511_v63 }
 0x29e   :  { %1614 = vmatprep.subr.bf16.mxu0 %v1112_v11  ;;  %2024 = vmatprep.subr.bf16.mxu1 %v1114_v4  ;;  %v1153_v11 = vunpack.c.h.s8.bf16 %v513_v35  ;;  %v2658_v4 = vld [vmem:[#allocation8 + $0x40] sm:$0xff]  }
 0x2a1   :  { %1615 = vmatpush1.bf16.msra.mxu0 %v1111_v7  ;;  %2025 = vmatpush1.bf16.msra.mxu1 %v1113_v45  ;;  %v2660_v7 = vld [vmem:[#allocation8] sm:$0xff]  }
 0x2a2   :  { %1616 = vmatprep.subr.bf16.mxu0 %v1116_v8  ;;  %2026 = vmatprep.subr.bf16.mxu1 %v1118_v9  ;;  %v2661_v45 = vld [vmem:[#allocation8 + $0x80] sm:$0xff]   ;;  %v2662_v8 = vld [vmem:[#allocation8 + $0x48] sm:$0xff]  }
 0x2a3   :  { %v2663_v9 = vld [vmem:[#allocation8 + $0xc8] sm:$0xff]  }
 0x2a5   :  { %1617 = vmatpush1.bf16.msra.mxu0 %v1115_v50  ;;  %2027 = vmatpush1.bf16.msra.mxu1 %v1117_v13  ;;  %v2666_v50 = vld [vmem:[#allocation8 + $0x50] sm:$0xff]  }
 0x2a6   :  { %1618 = vmatprep.subr.bf16.mxu0 %v1120_v14  ;;  %2028 = vmatprep.subr.bf16.mxu1 %v1122_v15  ;;  %v2667_v13 = vld [vmem:[#allocation8 + $0xd0] sm:$0xff]   ;;  %v2670_v15 = vld [vmem:[#allocation8 + $0x58] sm:$0xff]  }
 0x2a7   :  { %v2669_v14 = vld [vmem:[#allocation8 + $0x90] sm:$0xff]  }
 0x2a9   :  { %1619 = vmatpush1.bf16.msra.mxu0 %v1119_v26  ;;  %2029 = vmatpush1.bf16.msra.mxu1 %v1121_v18  ;;  %v2673_v26 = vld [vmem:[#allocation8 + $0x98] sm:$0xff]   ;;  %v2674_v18 = vld [vmem:[#allocation8 + $0x60] sm:$0xff]  }
 0x2aa   :  { %1620 = vmatprep.subr.bf16.mxu0 %v1124_v19  ;;  %2030 = vmatprep.subr.bf16.mxu1 %v1126_v22  ;;  %v2675_v19 = vld [vmem:[#allocation8 + $0xe0] sm:$0xff]  }
 0x2ab   :  { %v2676_v22 = vld [vmem:[#allocation8 + $0x20] sm:$0xff]  }
 0x2ad   :  { %1621 = vmatpush1.bf16.msra.mxu0 %v1123_v24  ;;  %2031 = vmatpush1.bf16.msra.mxu1 %v1125_v27  ;;  %v2679_v24 = vld [vmem:[#allocation8 + $0xe8] sm:$0xff]  }
 0x2ae   :  { %1622 = vmatprep.subr.bf16.mxu0 %v1128_v36  ;;  %2032 = vmatprep.subr.bf16.mxu1 %v1130_v28  ;;  %v2680_v27 = vld [vmem:[#allocation8 + $0x28] sm:$0xff]   ;;  %v2682_v28 = vld [vmem:[#allocation8 + $0x70] sm:$0xff]  }
 0x2af   :  { %v2681_v36 = vld [vmem:[#allocation8 + $0xa8] sm:$0xff]  }
 0x2b1   :  { %1623 = vmatpush1.bf16.msra.mxu0 %v1127_v32  ;;  %2033 = vmatpush1.bf16.msra.mxu1 %v1129_v56  ;;  %v2685_v32 = vld [vmem:[#allocation8 + $0xb0] sm:$0xff]   ;;  %v2686_v56 = vld [vmem:[#allocation8 + $0x78] sm:$0xff]  }
 0x2b2   :  { %1624 = vmatprep.subr.bf16.mxu0 %v1132_v33  ;;  %2034 = vmatprep.subr.bf16.mxu1 %v1134_v34  ;;  %v2687_v33 = vld [vmem:[#allocation8 + $0xf8] sm:$0xff]  }
 0x2b3   :  { %v2688_v34 = vld [vmem:[#allocation8 + $0x38] sm:$0xff]  }
 0x2b5   :  { %1625 = vmatpush1.bf16.msra.mxu0 %v1131_v46  ;;  %2035 = vmatpush1.bf16.msra.mxu1 %v1133_v38  ;;  %v2058_v46 = vshrl.u32 %v2057_v10, 7 }
 0x2b6   :  { %1626 = vmatprep.subr.bf16.mxu0 %v1136_v40  ;;  %2036 = vmatprep.subr.bf16.mxu1 %v1138_v41  ;;  %v2055_v41 = vld [vmem:[#allocation5] sm:$0xf] }
 0x2b7   :  { %v2059_v38 = vsub.s32 0, %v2058_v46  ;;  %v2067_v40 = vsub.s32 2, %v2058_v46  ;;  %v2063_v51 = vsub.s32 1, %v2058_v46  ;;  %v2071_v42 = vsub.s32 3, %v2058_v46 }
 0x2b9   :  { %1627 = vmatpush1.bf16.msra.mxu0 %v1135_v43  ;;  %2037 = vmatpush1.bf16.msra.mxu1 %v1137_v44  ;;  %v2081_v43 = vld [vmem:[#allocation7] sm:$0xf]  ;;  %v2060_v44 = vrot.slane %v2055_v41, %v2059_v38  ;;  %v2072_v20 = vrot.slane %v2055_v41, %v2071_v42 }
 0x2ba   :  { %1628 = vmatprep.subr.bf16.mxu0 %v1140_v47  ;;  %2038 = vmatprep.subr.bf16.mxu1 %v1142_v25  ;;  %v2068_v47 = vrot.slane %v2055_v41, %v2067_v40  ;;  %v2064_v25 = vrot.slane %v2055_v41, %v2063_v51  ;;  %v2086_v48 = vrot.slane %v2081_v43, %v2059_v38 }
 0x2bb   :  { %v2098_v54 = vrot.slane %v2081_v43, %v2071_v42 }
 0x2bd   :  { %1629 = vmatpush1.bf16.msra.mxu0 %v1139_v49  ;;  %2039 = vmatpush1.bf16.msra.mxu1 %v1141_v52  ;;  %v2094_v49 = vrot.slane %v2081_v43, %v2067_v40 }
 0x2be   :  { %1630 = vmatprep.subr.bf16.mxu0 %v1144_v62  ;;  %2040 = vmatprep.subr.bf16.mxu1 %v1146_v53  ;;  %v2090_v53 = vrot.slane %v2081_v43, %v2063_v51 }
 0x2c1   :  { %1631 = vmatpush1.bf16.msra.mxu0 %v1143_v58  ;;  %2041 = vmatpush1.bf16.msra.mxu1 %v1145_v31 }
 0x2c2   :  { %1632 = vmatprep.subr.bf16.mxu0 %v1148_v59  ;;  %2042 = vmatprep.subr.bf16.mxu1 %v1150_v60 }
 0x2c5   :  { %1633 = vmatpush1.bf16.msra.mxu0 %v1147_v57  ;;  %2043 = vmatpush1.bf16.msra.mxu1 %v1149_v0 }
 0x2c6   :  { %1634 = vmatprep.subr.bf16.mxu0 %v1152_v1  ;;  %2044 = vmatprep.subr.bf16.mxu1 %v1154_v2 }
 0x2c9   :  { %1635 = vmatpush1.bf16.msra.mxu0 %v1151_v3  ;;  %2045 = vmatpush1.bf16.msra.mxu1 %v1153_v11 }
 0x2ca   :  { %2531 = vmatprep.subr.bf16.mxu0 %v2658_v4  ;;  %2553 = vmatprep.subr.bf16.mxu1 %v2659_v5 }
 0x2cc   :  { %1637 = vmatmul.mubr.bf16.vlgmr.msra.gmra.mrb[0].mxu0 %v2487_v6  ;;  %2047 = vmatmul.mubr.bf16.vlgmr.msra.gmra.mrb[0].mxu1 %v2487_v6 }
 0x2cd   :  { %2532 = vmatpush3.bf16.msra.mxu0 %v2660_v7  ;;  %2554 = vmatpush3.bf16.msra.mxu1 %v2661_v45 }
 0x2ce   :  { %2533 = vmatprep.subr.bf16.mxu0 %v2662_v8  ;;  %2555 = vmatprep.subr.bf16.mxu1 %v2663_v9 }
 0x2d1   :  { %2534 = vmatpush3.bf16.msra.mxu0 %v2664_v12  ;;  %2556 = vmatpush3.bf16.msra.mxu1 %v2665_v21 }
 0x2d2   :  { %2535 = vmatprep.subr.bf16.mxu0 %v2666_v50  ;;  %2557 = vmatprep.subr.bf16.mxu1 %v2667_v13 }
 0x2d5   :  { %2536 = vmatpush3.bf16.msra.mxu0 %v2668_v39  ;;  %2558 = vmatpush3.bf16.msra.mxu1 %v2669_v14 }
 0x2d6   :  { %2537 = vmatprep.subr.bf16.mxu0 %v2670_v15  ;;  %2559 = vmatprep.subr.bf16.mxu1 %v2671_v16 }
 0x2d9   :  { %2538 = vmatpush3.bf16.msra.mxu0 %v2672_v17  ;;  %2560 = vmatpush3.bf16.msra.mxu1 %v2673_v26 }
 0x2da   :  { %2539 = vmatprep.subr.bf16.mxu0 %v2674_v18  ;;  %2561 = vmatprep.subr.bf16.mxu1 %v2675_v19 }
 0x2dd   :  { %2540 = vmatpush3.bf16.msra.mxu0 %v2676_v22  ;;  %2562 = vmatpush3.bf16.msra.mxu1 %v2677_v61 }
 0x2de   :  { %2541 = vmatprep.subr.bf16.mxu0 %v2678_v23  ;;  %2563 = vmatprep.subr.bf16.mxu1 %v2679_v24 }
 0x2e1   :  { %2542 = vmatpush3.bf16.msra.mxu0 %v2680_v27  ;;  %2564 = vmatpush3.bf16.msra.mxu1 %v2681_v36 }
 0x2e2   :  { %2543 = vmatprep.subr.bf16.mxu0 %v2682_v28  ;;  %2565 = vmatprep.subr.bf16.mxu1 %v2683_v29 }
 0x2e5   :  { %2544 = vmatpush3.bf16.msra.mxu0 %v2684_v30  ;;  %2566 = vmatpush3.bf16.msra.mxu1 %v2685_v32 }
 0x2e6   :  { %2545 = vmatprep.subr.bf16.mxu0 %v2686_v56  ;;  %2567 = vmatprep.subr.bf16.mxu1 %v2687_v33 }
 0x2e9   :  { %2546 = vmatpush3.bf16.msra.mxu0 %v2688_v34  ;;  %2568 = vmatpush3.bf16.msra.mxu1 %v2689_v37 }
 0x39f   :  { %v1638_v52 = vpop.f32.mrb[0].mxu0  ;;  %v2048_v62 = vpop.f32.mrb[0].mxu1 }
 0x3a0   :  { %v2077_v55 = vmul.f32 %v2060_v44, %v1638_v52  ;;  %v2079_v58 = vmul.f32 %v2068_v47, %v2048_v62  ;;  %v1640_v31 = vpop.f32.mrb[1].mxu0  ;;  %v2050_v59 = vpop.f32.mrb[1].mxu1 }
 0x3a1   :  { %v2078_v60 = vmul.f32 %v2064_v25, %v1640_v31  ;;  %v2080_v63 = vmul.f32 %v2072_v20, %v2050_v59  ;;  %v1642_v35 = vpop.f32.mrb[2].mxu0  ;;  %v2052_v57 = vpop.f32.mrb[2].mxu1 }
 0x3a2   :  { %v2103_v0 = vadd.f32 %v2086_v48, %v2077_v55  ;;  %v2105_v1 = vadd.f32 %v2094_v49, %v2079_v58  ;;  %v1643_v2 = vpop.f32.mrb[3].mxu0  ;;  %v2053_v3 = vpop.f32.mrb[3].mxu1 }
 0x3a3   :  { %v2104_v11 = vadd.f32 %v2090_v53, %v2078_v60  ;;  %v2106_v4 = vadd.f32 %v2098_v54, %v2080_v63 }
 0x3a4   :  { %v2107_v5 = vmax.f32 %v2103_v0, 0.0  ;;  %v2109_v6 = vmax.f32 %v2105_v1, 0.0 }
 0x3a5   :  { %v2108_v7 = vmax.f32 %v2104_v11, 0.0  ;;  %v2110_v45 = vmax.f32 %v2106_v4, 0.0 }
 0x3a6   :  { %v2111_v12 = vpack.c.bf16 %v2107_v5, %v2107_v5  ;;  %v2113_v21 = vpack.c.bf16 %v2109_v6, %v2109_v6 }
 0x3a7   :  { %v2112_v8 = vpack.c.bf16 %v2108_v7, %v2108_v7  ;;  %v2114_v9 = vpack.c.bf16 %v2110_v45, %v2110_v45 }
 0x3a9   :  { %2403 = vmatprep.mubr.bf16.mxu0 %v2112_v8  ;;  %2443 = vmatprep.mubr.bf16.mxu1 %v2114_v9 }
 0x3aa   :  { %2404 = vmatmul.mubr.bf16.vlgmr.msra.gmra.mrb[4].mxu0 %v2111_v12  ;;  %2444 = vmatmul.mubr.bf16.vlgmr.msra.gmra.mrb[4].mxu1 %v2113_v21 }
 0x47d   :  { %v2547_v50 = vpop.f32.mrb[4].mxu0  ;;  %v2569_v13 = vpop.f32.mrb[4].mxu1 }
 0x47e   :  { %v2548_v39 = vpop.f32.mrb[5].mxu0  ;;  %v2570_v14 = vpop.f32.mrb[5].mxu1 }
 0x47f   :  { %v2549_v15 = vadd.f32 %v2548_v39, %v2547_v50  ;;  %v2571_v16 = vadd.f32 %v2570_v14, %v2569_v13  ;;  %v2550_v17 = vpop.f32.mrb[6].mxu0  ;;  %v2572_v26 = vpop.f32.mrb[6].mxu1 }
 0x480   :  { %v2551_v18 = vpop.f32.mrb[7].mxu0  ;;  %v2573_v19 = vpop.f32.mrb[7].mxu1 }
 0x481   :  { %v2446_v22 = vadd.f32 %v2571_v16, %v2549_v15 }
 0x483   :  { %2451 = vst [vmem:[%s3045_s5] sm:$0xff] %v2446_v22 }
 0x484   :  { %2456 = vsyncpa [#allocation4], 1 }
 0x485   :  { %2457 = vsyncpa [#allocation6], 1 }
 0x486   :  { %2458 = vsyncpa [#allocation9], 1 }

</bundles_post_ra>
